<compile_context>
chip_gen: v7x
topology: tpu7x:2x2x1
jax: 0.10.0
libtpu: 0.0.40
codegen_flags: <defaults>
</compile_context>

<pallas_src>
import math

import jax
import jax.numpy as jnp
from jax.experimental import pallas as pl
from jax.experimental.pallas import tpu as pltpu  # noqa: F401  (TPU backend)

# ----------------------------- config (small, synthetic) -----------------------------
B = 2            # batch
S = 8            # seqlen
D = 64           # model dim
H = 4            # n_heads
HD = D // H      # head_dim
N_LAYERS = 3
HYPER_START = 1  # layers[HYPER_START:] receive hyper-generated LoRA params
N_HYPER = N_LAYERS - HYPER_START
VOCAB = 128
FFN_HIDDEN = 128
LORA_RANK = 4
COMPRESS = 16    # compress_dim (64 in the original; shrunk for the small demo)
EPS = 1e-5
ROPE_THETA = 10000.0

BS = B * S
R3 = 3 * LORA_RANK
D3 = 3 * D
LAYER_CHUNK = 6 * D * LORA_RANK            # [A_q A_k A_v B_q B_k B_v] flattened
HYPER_TOTAL = N_HYPER * LAYER_CHUNK        # 3072: lane-dense hyper-net output
NEG_INF = -1e9


# ------------------------------- fused per-layer kernel -------------------------------
def _layer_kernel(h_ref, attn_nw_ref, ffn_nw_ref, wqkv_ref, wo_ref, w13_ref,
                  w2_ref, cos_ref, sin_ref, pswap_ref, mask_ref,
                  la_ref, lb_ref, o_ref):
    f32, bf16 = jnp.float32, jnp.bfloat16
    x = h_ref[...]                                                 # (BS, D) f32

    # --- attention RMSNorm ---
    var = jnp.mean(x * x, axis=-1, keepdims=True)
    xn = x * jax.lax.rsqrt(var + EPS) * attn_nw_ref[...]
    xn_b = xn.astype(bf16)                                         # cast once, reuse

    # --- fused QKV projection (D -> 3D), bf16 MXU, f32 accumulate ---
    qkv = jnp.dot(xn_b, wqkv_ref[...], preferred_element_type=f32)

    # --- per-sample hyper-LoRA delta for q/k/v: 2 small dots per sample ---
    # la_ref: (B, D, 3r) = [A_q|A_k|A_v];  lb_ref: (B, 3r, 3D) block-diagonal B.
    deltas = []
    for b in range(B):
        xb = xn_b[b * S:(b + 1) * S, :]                            # (S, D) bf16
        xa = jnp.dot(xb, la_ref[b], preferred_element_type=f32)    # (S, 3r)
        deltas.append(jnp.dot(xa.astype(bf16), lb_ref[b],
                              preferred_element_type=f32))         # (S, 3D)
    qkv = qkv + jnp.concatenate(deltas, axis=0)                    # (BS, 3D)

    q = qkv[:, 0:D]
    k = qkv[:, D:2 * D]
    v = qkv[:, 2 * D:3 * D]

    # --- rotary: out = x*cos + (x @ P_pair_swap) * signed_sin (no strided slices) ---
    cos = cos_ref[...]                                             # (BS, D)
    sgn = sin_ref[...]                                             # (BS, D) signed sin
    pswap = pswap_ref[...]                                         # (D, D) bf16 perm

    def rot(t):
        sw = jnp.dot(t.astype(bf16), pswap, preferred_element_type=f32)
        return t * cos + sw * sgn

    q = rot(q)
    k = rot(k)

    # --- causal softmax attention: all (b, h) pairs unrolled in ONE program ---
    scale = 1.0 / math.sqrt(HD)
    mask = mask_ref[...]                                           # (S, S) additive
    rows = []
    for b in range(B):
        heads = []
        r0, r1 = b * S, (b + 1) * S
        for hh in range(H):
            c0, c1 = hh * HD, (hh + 1) * HD
            qh = q[r0:r1, c0:c1].astype(bf16)
            kh = k[r0:r1, c0:c1].astype(bf16)
            vh = v[r0:r1, c0:c1].astype(bf16)
            s = jax.lax.dot_general(qh, kh, (((1,), (1,)), ((), ())),
                                    preferred_element_type=f32) * scale
            s = s + mask
            m = jnp.max(s, axis=-1, keepdims=True)
            p = jnp.exp(s - m)
            l = jnp.sum(p, axis=-1, keepdims=True)
            p = p * pl.reciprocal(l, approx=True)                  # EUP divide
            heads.append(jnp.dot(p.astype(bf16), vh,
                                 preferred_element_type=f32))      # (S, HD)
        rows.append(jnp.concatenate(heads, axis=1))                # (S, D)
    attn = jnp.concatenate(rows, axis=0)                           # (BS, D)

    h1 = x + jnp.dot(attn.astype(bf16), wo_ref[...], preferred_element_type=f32)

    # --- FFN: RMSNorm + fused w1|w3 + SwiGLU + w2 + residual ---
    var2 = jnp.mean(h1 * h1, axis=-1, keepdims=True)
    x3 = (h1 * jax.lax.rsqrt(var2 + EPS) * ffn_nw_ref[...]).astype(bf16)
    ug = jnp.dot(x3, w13_ref[...], preferred_element_type=f32)     # (BS, 2F)
    u = ug[:, 0:FFN_HIDDEN]                                        # 128-lane aligned
    g = ug[:, FFN_HIDDEN:]
    sig = pl.reciprocal(1.0 + jnp.exp(-u), approx=True)            # silu via EUP
    act = (u * sig * g).astype(bf16)
    ff = jnp.dot(act, w2_ref[...], preferred_element_type=f32)
    o_ref[...] = h1 + ff


def fused_layer(h2, lp, cos2, sin2, pswap, mask2d, lora_a, lora_b):
    return pl.pallas_call(
        _layer_kernel,
        out_shape=jax.ShapeDtypeStruct((BS, D), jnp.float32),
    )(h2, lp["attn_norm"], lp["ffn_norm"], lp["wqkv"], lp["wo"], lp["w13"],
      lp["w2"], cos2, sin2, pswap, mask2d, lora_a, lora_b)


# ---------------------- fused masked-pool + hyper-net kernel ---------------------------
def _hyper_kernel(h_ref, m_ref, wc_ref, wh_ref, o_ref):
    f32, bf16 = jnp.float32, jnp.bfloat16
    h = h_ref[...]                                                 # (BS, D)
    m = m_ref[...]                                                 # (BS, 1)
    pools = []
    for b in range(B):
        hb = h[b * S:(b + 1) * S, :]
        mb = m[b * S:(b + 1) * S, :]
        num = jnp.sum(hb * mb, axis=0, keepdims=True)              # (1, D)
        den = jnp.maximum(jnp.sum(mb, axis=0, keepdims=True), 1.0)  # NaN guard
        pools.append(num / den)
    pool = jnp.concatenate(pools, axis=0)                          # (B, D)
    z = jnp.maximum(jnp.dot(pool.astype(bf16), wc_ref[...],
                            preferred_element_type=f32), 0.0)      # (B, COMPRESS)
    o_ref[...] = jnp.dot(z.astype(bf16), wh_ref[...],
                         preferred_element_type=f32)               # (B, HYPER_TOTAL)


# -------------------- fused final-norm + output head + cross-entropy ------------------
def _head_ce_kernel(h_ref, nw_ref, wout_ref, lab_ref, o_ref):
    f32, bf16 = jnp.float32, jnp.bfloat16
    x = h_ref[...]                                                 # (BS, D)
    var = jnp.mean(x * x, axis=-1, keepdims=True)
    xn = (x * jax.lax.rsqrt(var + EPS) * nw_ref[...]).astype(bf16)
    logits = jnp.dot(xn, wout_ref[...], preferred_element_type=f32)  # (BS, V) in VMEM
    labels = lab_ref[...]                                          # (BS, 1) int32
    mx = jnp.max(logits, axis=-1, keepdims=True)
    lse = mx + jnp.log(jnp.sum(jnp.exp(logits - mx), axis=-1, keepdims=True))
    col = jax.lax.broadcasted_iota(jnp.int32, logits.shape, 1)
    tgt = jnp.sum(jnp.where(col == labels, logits, 0.0), axis=-1, keepdims=True)
    per = lse - tgt                                                # (BS, 1)
    valid = (labels != 0).astype(f32)                              # ignore_index=0
    num = jnp.sum(per * valid, axis=0, keepdims=True)              # (1, 1)
    den = jnp.maximum(jnp.sum(valid, axis=0, keepdims=True), 1.0)
    o_ref[...] = num / den


# ------------------------------- glue: rotary / params --------------------------------
def rope_tables():
    inv = 1.0 / (ROPE_THETA ** (jnp.arange(0, HD, 2, dtype=jnp.float32) / HD))
    t = jnp.arange(S, dtype=jnp.float32)
    freqs = jnp.outer(t, inv)                                      # (S, HD//2)
    cos = jnp.repeat(jnp.cos(freqs), 2, axis=-1)                   # (S, HD): c0,c0,c1,c1,..
    sin = jnp.repeat(jnp.sin(freqs), 2, axis=-1)
    signs = jnp.tile(jnp.array([-1.0, 1.0], jnp.float32), HD // 2)  # (HD,): -,+,-,+,...
    cos_full = jnp.tile(cos, (1, H))                               # (S, D)
    sin_full = jnp.tile(sin * signs[None, :], (1, H))              # (S, D)
    cos2 = jnp.tile(cos_full, (B, 1))                              # (BS, D)
    sin2 = jnp.tile(sin_full, (B, 1))                              # (BS, D)
    idx = jnp.arange(D, dtype=jnp.int32)
    pswap = ((idx[:, None] ^ 1) == idx[None, :]).astype(jnp.bfloat16)  # pair-swap perm
    return cos2, sin2, pswap


def unpack_hyper(raw):
    """Split the single lane-dense hyper-net output into per-layer LoRA tensors.

    Returns per hyper layer: A_cat (B, D, 3r) and block-diagonal B_blk (B, 3r, 3D)."""
    dr = D * LORA_RANK
    out = []
    for hi in range(N_HYPER):
        off = hi * LAYER_CHUNK
        a_parts = [raw[:, off + t * dr: off + (t + 1) * dr].reshape(B, D, LORA_RANK)
                   for t in range(3)]
        a_cat = jnp.concatenate(a_parts, axis=-1)                  # (B, D, 3r)
        off_b = off + 3 * dr
        b_parts = [raw[:, off_b + t * dr: off_b + (t + 1) * dr].reshape(B, LORA_RANK, D)
                   for t in range(3)]
        z = jnp.zeros((B, LORA_RANK, D), jnp.float32)
        b_blk = jnp.concatenate([
            jnp.concatenate([b_parts[0], z, z], axis=2),
            jnp.concatenate([z, b_parts[1], z], axis=2),
            jnp.concatenate([z, z, b_parts[2]], axis=2)], axis=1)  # (B, 3r, 3D)
        out.append((a_cat.astype(jnp.bfloat16), b_blk.astype(jnp.bfloat16)))
    return out


def init_params(key):
    def nrm(k, shape, scale=0.02, dtype=jnp.float32):
        return (scale * jax.random.normal(k, shape, dtype=jnp.float32)).astype(dtype)

    bf16 = jnp.bfloat16
    keys = iter(jax.random.split(key, 64))
    params = {
        "tok_emb": nrm(next(keys), (VOCAB, D)),
        "norm": jnp.ones((1, D), jnp.float32),
        "output": nrm(next(keys), (D, VOCAB), dtype=bf16),
        "layers": [],
    }
    for _ in range(N_LAYERS):
        params["layers"].append({
            "attn_norm": jnp.ones((1, D), jnp.float32),
            "ffn_norm": jnp.ones((1, D), jnp.float32),
            "wqkv": nrm(next(keys), (D, 3 * D), dtype=bf16),          # wq|wk|wv fused
            "wo": nrm(next(keys), (D, D), dtype=bf16),
            "w13": nrm(next(keys), (D, 2 * FFN_HIDDEN), dtype=bf16),  # w1|w3 fused
            "w2": nrm(next(keys), (FFN_HIDDEN, D), dtype=bf16),
        })
    # TODO(synk): exact LoraParameterGenerator architecture is not in the reference
    # file; modeled as linear encoder (dim->compress, ReLU) + one fused linear head
    # producing all per-layer / per-target LoRA A/B tensors at once.
    params["hyper"] = {
        "w_compress": nrm(next(keys), (D, COMPRESS), dtype=bf16),
        "w_heads": nrm(next(keys), (COMPRESS, HYPER_TOTAL), dtype=bf16),
    }
    return params


# ------------------------------- model forward ----------------------------------------
def llama_adapter_forward(params, tokens, labels, prompt_mask):
    """Mirrors LLaMA_adapter.forward: returns (c_loss, c_loss)."""
    h = jnp.take(params["tok_emb"], tokens, axis=0).reshape(BS, D)  # embedding gather

    cos2, sin2, pswap = rope_tables()
    mask2d = jnp.triu(jnp.full((S, S), NEG_INF, dtype=jnp.float32), k=1)

    zero_a = jnp.zeros((B, D, R3), jnp.bfloat16)
    zero_b = jnp.zeros((B, R3, D3), jnp.bfloat16)

    # layers before hyper-LoRA start (zero LoRA delta)
    for lp in params["layers"][:HYPER_START]:
        h = fused_layer(h, lp, cos2, sin2, pswap, mask2d, zero_a, zero_b)

    # hyper-LoRA branch (hyper_input_type='single', serial_generate=False).
    # stop_gradient on the pooled hidden state mirrors pooling_states.detach().
    m2 = prompt_mask.reshape(BS, 1).astype(jnp.float32)
    raw = pl.pallas_call(
        _hyper_kernel,
        out_shape=jax.ShapeDtypeStruct((B, HYPER_TOTAL), jnp.float32),
    )(jax.lax.stop_gradient(h), m2,
      params["hyper"]["w_compress"], params["hyper"]["w_heads"])
    lora = unpack_hyper(raw)

    for hi, lp in enumerate(params["layers"][HYPER_START:]):
        a_cat, b_blk = lora[hi]
        h = fused_layer(h, lp, cos2, sin2, pswap, mask2d, a_cat, b_blk)

    # final norm + output head + CE fused; logits[:, :-1] / labels[:, 1:] handled by
    # shifting labels and letting ignore_index=0 drop the last position of each row.
    lab_shift = jnp.concatenate(
        [labels[:, 1:], jnp.zeros((B, 1), labels.dtype)], axis=1
    ).reshape(BS, 1).astype(jnp.int32)
    ce = pl.pallas_call(
        _head_ce_kernel,
        out_shape=jax.ShapeDtypeStruct((1, 1), jnp.float32),
    )(h, params["norm"], params["output"], lab_shift)[0, 0]

    c_loss = jnp.where(jnp.sum(lab_shift) == 0, 0.0, ce)
    return c_loss, c_loss


# ---------------------------------- main ------------------------------------------------
if __name__ == "__main__":
    key = jax.random.PRNGKey(0)
    kp, kt = jax.random.split(key)
    params = init_params(kp)

    tokens = jax.random.randint(kt, (B, S), 1, VOCAB, dtype=jnp.int32)
    labels = tokens                                               # next-token LM labels
    prompt_lens = jnp.array([[5], [6]], dtype=jnp.int32)
    prompt_mask = (jnp.arange(S)[None, :] < prompt_lens).astype(jnp.float32)

    fwd = jax.jit(llama_adapter_forward)
    c_loss, _ = fwd(params, tokens, labels, prompt_mask)
    c_loss = jax.block_until_ready(c_loss)
    assert bool(jnp.isfinite(c_loss)), f"loss not finite: {c_loss}"
    print("KERNEL_OK")
</pallas_src>

<mosaic_0001>
module attributes {stable_mosaic.version = 11 : i64} {
  func.func @_hyper_kernel(%arg0: memref<16x64xf32, #tpu.memory_space<vmem>>, %arg1: memref<16x1xf32, #tpu.memory_space<vmem>>, %arg2: memref<64x16xbf16, #tpu.memory_space<vmem>>, %arg3: memref<16x3072xbf16, #tpu.memory_space<vmem>>, %arg4: memref<2x3072xf32, #tpu.memory_space<vmem>>) attributes {dimension_semantics = [], scalar_prefetch = 0 : i64, scratch_operands = 0 : i64, tpu.core_type = #tpu.core_type<tc>} {
    %c0 = arith.constant 0 : index
    %c0_0 = arith.constant 0 : index
    %0 = vector.load %arg0[%c0, %c0_0] : memref<16x64xf32, #tpu.memory_space<vmem>>, vector<16x64xf32>
    %c0_1 = arith.constant 0 : index
    %c0_2 = arith.constant 0 : index
    %1 = vector.load %arg1[%c0_1, %c0_2] : memref<16x1xf32, #tpu.memory_space<vmem>>, vector<16x1xf32>
    %2 = vector.extract_strided_slice %0 {offsets = [0, 0], sizes = [8, 64], strides = [1, 1]} : vector<16x64xf32> to vector<8x64xf32>
    %3 = vector.extract_strided_slice %1 {offsets = [0, 0], sizes = [8, 1], strides = [1, 1]} : vector<16x1xf32> to vector<8x1xf32>
    %4 = vector.broadcast %3 : vector<8x1xf32> to vector<8x64xf32>
    %5 = arith.mulf %2, %4 : vector<8x64xf32>
    %cst = arith.constant dense<0.000000e+00> : vector<64xf32>
    %6 = vector.multi_reduction <add>, %5, %cst [0] : vector<8x64xf32> to vector<64xf32>
    %7 = vector.shape_cast %6 : vector<64xf32> to vector<1x64xf32>
    %cst_3 = arith.constant dense<0.000000e+00> : vector<1xf32>
    %8 = vector.multi_reduction <add>, %3, %cst_3 [0] : vector<8x1xf32> to vector<1xf32>
    %9 = vector.shape_cast %8 : vector<1xf32> to vector<1x1xf32>
    %cst_4 = arith.constant 1.000000e+00 : f32
    %10 = vector.broadcast %cst_4 : f32 to vector<1x1xf32>
    %11 = arith.maximumf %9, %10 : vector<1x1xf32>
    %12 = vector.broadcast %11 : vector<1x1xf32> to vector<1x64xf32>
    %13 = arith.divf %7, %12 : vector<1x64xf32>
    %14 = vector.extract_strided_slice %0 {offsets = [8, 0], sizes = [8, 64], strides = [1, 1]} : vector<16x64xf32> to vector<8x64xf32>
    %15 = vector.extract_strided_slice %1 {offsets = [8, 0], sizes = [8, 1], strides = [1, 1]} : vector<16x1xf32> to vector<8x1xf32>
    %16 = vector.broadcast %15 : vector<8x1xf32> to vector<8x64xf32>
    %17 = arith.mulf %14, %16 : vector<8x64xf32>
    %cst_5 = arith.constant dense<0.000000e+00> : vector<64xf32>
    %18 = vector.multi_reduction <add>, %17, %cst_5 [0] : vector<8x64xf32> to vector<64xf32>
    %19 = vector.shape_cast %18 : vector<64xf32> to vector<1x64xf32>
    %cst_6 = arith.constant dense<0.000000e+00> : vector<1xf32>
    %20 = vector.multi_reduction <add>, %15, %cst_6 [0] : vector<8x1xf32> to vector<1xf32>
    %21 = vector.shape_cast %20 : vector<1xf32> to vector<1x1xf32>
    %cst_7 = arith.constant 1.000000e+00 : f32
    %22 = vector.broadcast %cst_7 : f32 to vector<1x1xf32>
    %23 = arith.maximumf %21, %22 : vector<1x1xf32>
    %24 = vector.broadcast %23 : vector<1x1xf32> to vector<1x64xf32>
    %25 = arith.divf %19, %24 : vector<1x64xf32>
    %26 = tpu.concatenate %13, %25 in 0 : vector<1x64xf32>, vector<1x64xf32> -> vector<2x64xf32>
    %27 = arith.truncf %26 : vector<2x64xf32> to vector<2x64xbf16>
    %c0_8 = arith.constant 0 : index
    %c0_9 = arith.constant 0 : index
    %28 = vector.load %arg2[%c0_8, %c0_9] : memref<64x16xbf16, #tpu.memory_space<vmem>>, vector<64x16xbf16>
    %cst_10 = arith.constant dense<0.000000e+00> : vector<2x16xf32>
    %29 = tpu.matmul %27, %28, %cst_10 {dimension_numbers = #tpu.dot_dimension_numbers<[1], [0], [0], [1], [0, 0, 1, 1], [], []>} : vector<2x64xbf16>, vector<64x16xbf16>, vector<2x16xf32> -> vector<2x16xf32>
    %cst_11 = arith.constant 0.000000e+00 : f32
    %30 = vector.broadcast %cst_11 : f32 to vector<2x16xf32>
    %31 = arith.maximumf %29, %30 : vector<2x16xf32>
    %32 = arith.truncf %31 : vector<2x16xf32> to vector<2x16xbf16>
    %c0_12 = arith.constant 0 : index
    %c0_13 = arith.constant 0 : index
    %33 = vector.load %arg3[%c0_12, %c0_13] : memref<16x3072xbf16, #tpu.memory_space<vmem>>, vector<16x3072xbf16>
    %cst_14 = arith.constant dense<0.000000e+00> : vector<2x3072xf32>
    %34 = tpu.matmul %32, %33, %cst_14 {dimension_numbers = #tpu.dot_dimension_numbers<[1], [0], [0], [1], [0, 0, 1, 1], [], []>} : vector<2x16xbf16>, vector<16x3072xbf16>, vector<2x3072xf32> -> vector<2x3072xf32>
    %c0_15 = arith.constant 0 : index
    %c0_16 = arith.constant 0 : index
    %35 = vector.load %arg4[%c0_15, %c0_16] : memref<2x3072xf32, #tpu.memory_space<vmem>>, vector<2x3072xf32>
    tpu.vector_store %arg4[%c0_15, %c0_16], %34 {strides = array<i32>} : memref<2x3072xf32, #tpu.memory_space<vmem>>, vector<2x3072xf32>,
    return
  }
}

module attributes {stable_mosaic.version = 11 : i64} {
  func.func @_layer_kernel(%arg0: memref<16x64xf32, #tpu.memory_space<vmem>>, %arg1: memref<1x64xf32, #tpu.memory_space<vmem>>, %arg2: memref<1x64xf32, #tpu.memory_space<vmem>>, %arg3: memref<64x192xbf16, #tpu.memory_space<vmem>>, %arg4: memref<64x64xbf16, #tpu.memory_space<vmem>>, %arg5: memref<64x256xbf16, #tpu.memory_space<vmem>>, %arg6: memref<128x64xbf16, #tpu.memory_space<vmem>>, %arg7: memref<16x64xf32, #tpu.memory_space<vmem>>, %arg8: memref<16x64xf32, #tpu.memory_space<vmem>>, %arg9: memref<64x64xbf16, #tpu.memory_space<vmem>>, %arg10: memref<8x8xf32, #tpu.memory_space<vmem>>, %arg11: memref<2x64x12xbf16, #tpu.memory_space<vmem>>, %arg12: memref<2x12x192xbf16, #tpu.memory_space<vmem>>, %arg13: memref<16x64xf32, #tpu.memory_space<vmem>>) attributes {dimension_semantics = [], scalar_prefetch = 0 : i64, scratch_operands = 0 : i64, tpu.core_type = #tpu.core_type<tc>} {
    %c0 = arith.constant 0 : index
    %c0_0 = arith.constant 0 : index
    %0 = vector.load %arg0[%c0, %c0_0] : memref<16x64xf32, #tpu.memory_space<vmem>>, vector<16x64xf32>
    %1 = arith.mulf %0, %0 : vector<16x64xf32>
    %cst = arith.constant dense<0.000000e+00> : vector<16xf32>
    %2 = vector.multi_reduction <add>, %1, %cst [1] : vector<16x64xf32> to vector<16xf32>
    %3 = vector.shape_cast %2 : vector<16xf32> to vector<16x1xf32>
    %cst_1 = arith.constant 6.400000e+01 : f32
    %4 = vector.broadcast %cst_1 : f32 to vector<16x1xf32>
    %5 = arith.divf %3, %4 : vector<16x1xf32>
    %cst_2 = arith.constant 9.99999974E-6 : f32
    %6 = vector.broadcast %cst_2 : f32 to vector<16x1xf32>
    %7 = arith.addf %5, %6 : vector<16x1xf32>
    %8 = math.rsqrt %7 : vector<16x1xf32>
    %9 = vector.broadcast %8 : vector<16x1xf32> to vector<16x64xf32>
    %10 = arith.mulf %0, %9 : vector<16x64xf32>
    %c0_3 = arith.constant 0 : index
    %c0_4 = arith.constant 0 : index
    %11 = vector.load %arg1[%c0_3, %c0_4] : memref<1x64xf32, #tpu.memory_space<vmem>>, vector<1x64xf32>
    %12 = vector.broadcast %11 : vector<1x64xf32> to vector<16x64xf32>
    %13 = arith.mulf %10, %12 : vector<16x64xf32>
    %14 = arith.truncf %13 : vector<16x64xf32> to vector<16x64xbf16>
    %c0_5 = arith.constant 0 : index
    %c0_6 = arith.constant 0 : index
    %15 = vector.load %arg3[%c0_5, %c0_6] : memref<64x192xbf16, #tpu.memory_space<vmem>>, vector<64x192xbf16>
    %cst_7 = arith.constant dense<0.000000e+00> : vector<16x192xf32>
    %16 = tpu.matmul %14, %15, %cst_7 {dimension_numbers = #tpu.dot_dimension_numbers<[1], [0], [0], [1], [0, 0, 1, 1], [], []>} : vector<16x64xbf16>, vector<64x192xbf16>, vector<16x192xf32> -> vector<16x192xf32>
    %17 = vector.extract_strided_slice %14 {offsets = [0, 0], sizes = [8, 64], strides = [1, 1]} : vector<16x64xbf16> to vector<8x64xbf16>
    %c0_8 = arith.constant 0 : index
    %c0_9 = arith.constant 0 : index
    %c0_10 = arith.constant 0 : index
    %18 = vector.load %arg11[%c0_8, %c0_9, %c0_10] : memref<2x64x12xbf16, #tpu.memory_space<vmem>>, vector<1x64x12xbf16>
    %19 = vector.shape_cast %18 : vector<1x64x12xbf16> to vector<64x12xbf16>
    %cst_11 = arith.constant dense<0.000000e+00> : vector<8x12xf32>
    %20 = tpu.matmul %17, %19, %cst_11 {dimension_numbers = #tpu.dot_dimension_numbers<[1], [0], [0], [1], [0, 0, 1, 1], [], []>} : vector<8x64xbf16>, vector<64x12xbf16>, vector<8x12xf32> -> vector<8x12xf32>
    %21 = arith.truncf %20 : vector<8x12xf32> to vector<8x12xbf16>
    %c0_12 = arith.constant 0 : index
    %c0_13 = arith.constant 0 : index
    %c0_14 = arith.constant 0 : index
    %22 = vector.load %arg12[%c0_12, %c0_13, %c0_14] : memref<2x12x192xbf16, #tpu.memory_space<vmem>>, vector<1x12x192xbf16>
    %23 = vector.shape_cast %22 : vector<1x12x192xbf16> to vector<12x192xbf16>
    %cst_15 = arith.constant dense<0.000000e+00> : vector<8x192xf32>
    %24 = tpu.matmul %21, %23, %cst_15 {dimension_numbers = #tpu.dot_dimension_numbers<[1], [0], [0], [1], [0, 0, 1, 1], [], []>} : vector<8x12xbf16>, vector<12x192xbf16>, vector<8x192xf32> -> vector<8x192xf32>
    %25 = vector.extract_strided_slice %14 {offsets = [8, 0], sizes = [8, 64], strides = [1, 1]} : vector<16x64xbf16> to vector<8x64xbf16>
    %c1 = arith.constant 1 : index
    %c0_16 = arith.constant 0 : index
    %c0_17 = arith.constant 0 : index
    %26 = vector.load %arg11[%c1, %c0_16, %c0_17] : memref<2x64x12xbf16, #tpu.memory_space<vmem>>, vector<1x64x12xbf16>
    %27 = vector.shape_cast %26 : vector<1x64x12xbf16> to vector<64x12xbf16>
    %cst_18 = arith.constant dense<0.000000e+00> : vector<8x12xf32>
    %28 = tpu.matmul %25, %27, %cst_18 {dimension_numbers = #tpu.dot_dimension_numbers<[1], [0], [0], [1], [0, 0, 1, 1], [], []>} : vector<8x64xbf16>, vector<64x12xbf16>, vector<8x12xf32> -> vector<8x12xf32>
    %29 = arith.truncf %28 : vector<8x12xf32> to vector<8x12xbf16>
    %c1_19 = arith.constant 1 : index
    %c0_20 = arith.constant 0 : index
    %c0_21 = arith.constant 0 : index
    %30 = vector.load %arg12[%c1_19, %c0_20, %c0_21] : memref<2x12x192xbf16, #tpu.memory_space<vmem>>, vector<1x12x192xbf16>
    %31 = vector.shape_cast %30 : vector<1x12x192xbf16> to vector<12x192xbf16>
    %cst_22 = arith.constant dense<0.000000e+00> : vector<8x192xf32>
    %32 = tpu.matmul %29, %31, %cst_22 {dimension_numbers = #tpu.dot_dimension_numbers<[1], [0], [0], [1], [0, 0, 1, 1], [], []>} : vector<8x12xbf16>, vector<12x192xbf16>, vector<8x192xf32> -> vector<8x192xf32>
    %33 = tpu.concatenate %24, %32 in 0 : vector<8x192xf32>, vector<8x192xf32> -> vector<16x192xf32>
    %34 = arith.addf %16, %33 : vector<16x192xf32>
    %35 = vector.extract_strided_slice %34 {offsets = [0, 0], sizes = [16, 64], strides = [1, 1]} : vector<16x192xf32> to vector<16x64xf32>
    %36 = vector.extract_strided_slice %34 {offsets = [0, 64], sizes = [16, 64], strides = [1, 1]} : vector<16x192xf32> to vector<16x64xf32>
    %37 = vector.extract_strided_slice %34 {offsets = [0, 128], sizes = [16, 64], strides = [1, 1]} : vector<16x192xf32> to vector<16x64xf32>
    %c0_23 = arith.constant 0 : index
    %c0_24 = arith.constant 0 : index
    %38 = vector.load %arg7[%c0_23, %c0_24] : memref<16x64xf32, #tpu.memory_space<vmem>>, vector<16x64xf32>
    %c0_25 = arith.constant 0 : index
    %c0_26 = arith.constant 0 : index
    %39 = vector.load %arg8[%c0_25, %c0_26] : memref<16x64xf32, #tpu.memory_space<vmem>>, vector<16x64xf32>
    %c0_27 = arith.constant 0 : index
    %c0_28 = arith.constant 0 : index
    %40 = vector.load %arg9[%c0_27, %c0_28] : memref<64x64xbf16, #tpu.memory_space<vmem>>, vector<64x64xbf16>
    %41 = arith.truncf %35 : vector<16x64xf32> to vector<16x64xbf16>
    %cst_29 = arith.constant dense<0.000000e+00> : vector<16x64xf32>
    %42 = tpu.matmul %41, %40, %cst_29 {dimension_numbers = #tpu.dot_dimension_numbers<[1], [0], [0], [1], [0, 0, 1, 1], [], []>} : vector<16x64xbf16>, vector<64x64xbf16>, vector<16x64xf32> -> vector<16x64xf32>
    %43 = arith.mulf %35, %38 : vector<16x64xf32>
    %44 = arith.mulf %42, %39 : vector<16x64xf32>
    %45 = arith.addf %43, %44 : vector<16x64xf32>
    %46 = arith.truncf %36 : vector<16x64xf32> to vector<16x64xbf16>
    %cst_30 = arith.constant dense<0.000000e+00> : vector<16x64xf32>
    %47 = tpu.matmul %46, %40, %cst_30 {dimension_numbers = #tpu.dot_dimension_numbers<[1], [0], [0], [1], [0, 0, 1, 1], [], []>} : vector<16x64xbf16>, vector<64x64xbf16>, vector<16x64xf32> -> vector<16x64xf32>
    %48 = arith.mulf %36, %38 : vector<16x64xf32>
    %49 = arith.mulf %47, %39 : vector<16x64xf32>
    %50 = arith.addf %48, %49 : vector<16x64xf32>
    %c0_31 = arith.constant 0 : index
    %c0_32 = arith.constant 0 : index
    %51 = vector.load %arg10[%c0_31, %c0_32] : memref<8x8xf32, #tpu.memory_space<vmem>>, vector<8x8xf32>
    %52 = vector.extract_strided_slice %45 {offsets = [0, 0], sizes = [8, 16], strides = [1, 1]} : vector<16x64xf32> to vector<8x16xf32>
    %53 = arith.truncf %52 : vector<8x16xf32> to vector<8x16xbf16>
    %54 = vector.extract_strided_slice %50 {offsets = [0, 0], sizes = [8, 16], strides = [1, 1]} : vector<16x64xf32> to vector<8x16xf32>
    %55 = arith.truncf %54 : vector<8x16xf32> to vector<8x16xbf16>
    %56 = vector.extract_strided_slice %37 {offsets = [0, 0], sizes = [8, 16], strides = [1, 1]} : vector<16x64xf32> to vector<8x16xf32>
    %57 = arith.truncf %56 : vector<8x16xf32> to vector<8x16xbf16>
    %cst_33 = arith.constant dense<0.000000e+00> : vector<8x8xf32>
    %58 = tpu.matmul %53, %55, %cst_33 {dimension_numbers = #tpu.dot_dimension_numbers<[1], [1], [0], [0], [0, 0, 1, 0], [], []>} : vector<8x16xbf16>, vector<8x16xbf16>, vector<8x8xf32> -> vector<8x8xf32>
    %cst_34 = arith.constant 2.500000e-01 : f32
    %59 = vector.broadcast %cst_34 : f32 to vector<8x8xf32>
    %60 = arith.mulf %58, %59 : vector<8x8xf32>
    %61 = arith.addf %60, %51 : vector<8x8xf32>
    %cst_35 = arith.constant dense<0xFF800000> : vector<8xf32>
    %62 = vector.multi_reduction <maximumf>, %61, %cst_35 [1] : vector<8x8xf32> to vector<8xf32>
    %63 = vector.shape_cast %62 : vector<8xf32> to vector<8x1xf32>
    %64 = vector.broadcast %63 : vector<8x1xf32> to vector<8x8xf32>
    %65 = arith.subf %61, %64 : vector<8x8xf32>
    %66 = math.exp %65 : vector<8x8xf32>
    %cst_36 = arith.constant dense<0.000000e+00> : vector<8xf32>
    %67 = vector.multi_reduction <add>, %66, %cst_36 [1] : vector<8x8xf32> to vector<8xf32>
    %68 = vector.shape_cast %67 : vector<8xf32> to vector<8x1xf32>
    %69 = tpu.reciprocal %68 {approx = true} : vector<8x1xf32> -> vector<8x1xf32>
    %70 = vector.broadcast %69 : vector<8x1xf32> to vector<8x8xf32>
    %71 = arith.mulf %66, %70 : vector<8x8xf32>
    %72 = arith.truncf %71 : vector<8x8xf32> to vector<8x8xbf16>
    %cst_37 = arith.constant dense<0.000000e+00> : vector<8x16xf32>
    %73 = tpu.matmul %72, %57, %cst_37 {dimension_numbers = #tpu.dot_dimension_numbers<[1], [0], [0], [1], [0, 0, 1, 1], [], []>} : vector<8x8xbf16>, vector<8x16xbf16>, vector<8x16xf32> -> vector<8x16xf32>
    %74 = vector.extract_strided_slice %45 {offsets = [0, 16], sizes = [8, 16], strides = [1, 1]} : vector<16x64xf32> to vector<8x16xf32>
    %75 = arith.truncf %74 : vector<8x16xf32> to vector<8x16xbf16>
    %76 = vector.extract_strided_slice %50 {offsets = [0, 16], sizes = [8, 16], strides = [1, 1]} : vector<16x64xf32> to vector<8x16xf32>
    %77 = arith.truncf %76 : vector<8x16xf32> to vector<8x16xbf16>
    %78 = vector.extract_strided_slice %37 {offsets = [0, 16], sizes = [8, 16], strides = [1, 1]} : vector<16x64xf32> to vector<8x16xf32>
    %79 = arith.truncf %78 : vector<8x16xf32> to vector<8x16xbf16>
    %cst_38 = arith.constant dense<0.000000e+00> : vector<8x8xf32>
    %80 = tpu.matmul %75, %77, %cst_38 {dimension_numbers = #tpu.dot_dimension_numbers<[1], [1], [0], [0], [0, 0, 1, 0], [], []>} : vector<8x16xbf16>, vector<8x16xbf16>, vector<8x8xf32> -> vector<8x8xf32>
    %cst_39 = arith.constant 2.500000e-01 : f32
    %81 = vector.broadcast %cst_39 : f32 to vector<8x8xf32>
    %82 = arith.mulf %80, %81 : vector<8x8xf32>
    %83 = arith.addf %82, %51 : vector<8x8xf32>
    %cst_40 = arith.constant dense<0xFF800000> : vector<8xf32>
    %84 = vector.multi_reduction <maximumf>, %83, %cst_40 [1] : vector<8x8xf32> to vector<8xf32>
    %85 = vector.shape_cast %84 : vector<8xf32> to vector<8x1xf32>
    %86 = vector.broadcast %85 : vector<8x1xf32> to vector<8x8xf32>
    %87 = arith.subf %83, %86 : vector<8x8xf32>
    %88 = math.exp %87 : vector<8x8xf32>
    %cst_41 = arith.constant dense<0.000000e+00> : vector<8xf32>
    %89 = vector.multi_reduction <add>, %88, %cst_41 [1] : vector<8x8xf32> to vector<8xf32>
    %90 = vector.shape_cast %89 : vector<8xf32> to vector<8x1xf32>
    %91 = tpu.reciprocal %90 {approx = true} : vector<8x1xf32> -> vector<8x1xf32>
    %92 = vector.broadcast %91 : vector<8x1xf32> to vector<8x8xf32>
    %93 = arith.mulf %88, %92 : vector<8x8xf32>
    %94 = arith.truncf %93 : vector<8x8xf32> to vector<8x8xbf16>
    %cst_42 = arith.constant dense<0.000000e+00> : vector<8x16xf32>
    %95 = tpu.matmul %94, %79, %cst_42 {dimension_numbers = #tpu.dot_dimension_numbers<[1], [0], [0], [1], [0, 0, 1, 1], [], []>} : vector<8x8xbf16>, vector<8x16xbf16>, vector<8x16xf32> -> vector<8x16xf32>
    %96 = vector.extract_strided_slice %45 {offsets = [0, 32], sizes = [8, 16], strides = [1, 1]} : vector<16x64xf32> to vector<8x16xf32>
    %97 = arith.truncf %96 : vector<8x16xf32> to vector<8x16xbf16>
    %98 = vector.extract_strided_slice %50 {offsets = [0, 32], sizes = [8, 16], strides = [1, 1]} : vector<16x64xf32> to vector<8x16xf32>
    %99 = arith.truncf %98 : vector<8x16xf32> to vector<8x16xbf16>
    %100 = vector.extract_strided_slice %37 {offsets = [0, 32], sizes = [8, 16], strides = [1, 1]} : vector<16x64xf32> to vector<8x16xf32>
    %101 = arith.truncf %100 : vector<8x16xf32> to vector<8x16xbf16>
    %cst_43 = arith.constant dense<0.000000e+00> : vector<8x8xf32>
    %102 = tpu.matmul %97, %99, %cst_43 {dimension_numbers = #tpu.dot_dimension_numbers<[1], [1], [0], [0], [0, 0, 1, 0], [], []>} : vector<8x16xbf16>, vector<8x16xbf16>, vector<8x8xf32> -> vector<8x8xf32>
    %cst_44 = arith.constant 2.500000e-01 : f32
    %103 = vector.broadcast %cst_44 : f32 to vector<8x8xf32>
    %104 = arith.mulf %102, %103 : vector<8x8xf32>
    %105 = arith.addf %104, %51 : vector<8x8xf32>
    %cst_45 = arith.constant dense<0xFF800000> : vector<8xf32>
    %106 = vector.multi_reduction <maximumf>, %105, %cst_45 [1] : vector<8x8xf32> to vector<8xf32>
    %107 = vector.shape_cast %106 : vector<8xf32> to vector<8x1xf32>
    %108 = vector.broadcast %107 : vector<8x1xf32> to vector<8x8xf32>
    %109 = arith.subf %105, %108 : vector<8x8xf32>
    %110 = math.exp %109 : vector<8x8xf32>
    %cst_46 = arith.constant dense<0.000000e+00> : vector<8xf32>
    %111 = vector.multi_reduction <add>, %110, %cst_46 [1] : vector<8x8xf32> to vector<8xf32>
    %112 = vector.shape_cast %111 : vector<8xf32> to vector<8x1xf32>
    %113 = tpu.reciprocal %112 {approx = true} : vector<8x1xf32> -> vector<8x1xf32>
    %114 = vector.broadcast %113 : vector<8x1xf32> to vector<8x8xf32>
    %115 = arith.mulf %110, %114 : vector<8x8xf32>
    %116 = arith.truncf %115 : vector<8x8xf32> to vector<8x8xbf16>
    %cst_47 = arith.constant dense<0.000000e+00> : vector<8x16xf32>
    %117 = tpu.matmul %116, %101, %cst_47 {dimension_numbers = #tpu.dot_dimension_numbers<[1], [0], [0], [1], [0, 0, 1, 1], [], []>} : vector<8x8xbf16>, vector<8x16xbf16>, vector<8x16xf32> -> vector<8x16xf32>
    %118 = vector.extract_strided_slice %45 {offsets = [0, 48], sizes = [8, 16], strides = [1, 1]} : vector<16x64xf32> to vector<8x16xf32>
    %119 = arith.truncf %118 : vector<8x16xf32> to vector<8x16xbf16>
    %120 = vector.extract_strided_slice %50 {offsets = [0, 48], sizes = [8, 16], strides = [1, 1]} : vector<16x64xf32> to vector<8x16xf32>
    %121 = arith.truncf %120 : vector<8x16xf32> to vector<8x16xbf16>
    %122 = vector.extract_strided_slice %37 {offsets = [0, 48], sizes = [8, 16], strides = [1, 1]} : vector<16x64xf32> to vector<8x16xf32>
    %123 = arith.truncf %122 : vector<8x16xf32> to vector<8x16xbf16>
    %cst_48 = arith.constant dense<0.000000e+00> : vector<8x8xf32>
    %124 = tpu.matmul %119, %121, %cst_48 {dimension_numbers = #tpu.dot_dimension_numbers<[1], [1], [0], [0], [0, 0, 1, 0], [], []>} : vector<8x16xbf16>, vector<8x16xbf16>, vector<8x8xf32> -> vector<8x8xf32>
    %cst_49 = arith.constant 2.500000e-01 : f32
    %125 = vector.broadcast %cst_49 : f32 to vector<8x8xf32>
    %126 = arith.mulf %124, %125 : vector<8x8xf32>
    %127 = arith.addf %126, %51 : vector<8x8xf32>
    %cst_50 = arith.constant dense<0xFF800000> : vector<8xf32>
    %128 = vector.multi_reduction <maximumf>, %127, %cst_50 [1] : vector<8x8xf32> to vector<8xf32>
    %129 = vector.shape_cast %128 : vector<8xf32> to vector<8x1xf32>
    %130 = vector.broadcast %129 : vector<8x1xf32> to vector<8x8xf32>
    %131 = arith.subf %127, %130 : vector<8x8xf32>
    %132 = math.exp %131 : vector<8x8xf32>
    %cst_51 = arith.constant dense<0.000000e+00> : vector<8xf32>
    %133 = vector.multi_reduction <add>, %132, %cst_51 [1] : vector<8x8xf32> to vector<8xf32>
    %134 = vector.shape_cast %133 : vector<8xf32> to vector<8x1xf32>
    %135 = tpu.reciprocal %134 {approx = true} : vector<8x1xf32> -> vector<8x1xf32>
    %136 = vector.broadcast %135 : vector<8x1xf32> to vector<8x8xf32>
    %137 = arith.mulf %132, %136 : vector<8x8xf32>
    %138 = arith.truncf %137 : vector<8x8xf32> to vector<8x8xbf16>
    %cst_52 = arith.constant dense<0.000000e+00> : vector<8x16xf32>
    %139 = tpu.matmul %138, %123, %cst_52 {dimension_numbers = #tpu.dot_dimension_numbers<[1], [0], [0], [1], [0, 0, 1, 1], [], []>} : vector<8x8xbf16>, vector<8x16xbf16>, vector<8x16xf32> -> vector<8x16xf32>
    %140 = tpu.concatenate %73, %95, %117, %139 in 1 : vector<8x16xf32>, vector<8x16xf32>, vector<8x16xf32>, vector<8x16xf32> -> vector<8x64xf32>
    %141 = vector.extract_strided_slice %45 {offsets = [8, 0], sizes = [8, 16], strides = [1, 1]} : vector<16x64xf32> to vector<8x16xf32>
    %142 = arith.truncf %141 : vector<8x16xf32> to vector<8x16xbf16>
    %143 = vector.extract_strided_slice %50 {offsets = [8, 0], sizes = [8, 16], strides = [1, 1]} : vector<16x64xf32> to vector<8x16xf32>
    %144 = arith.truncf %143 : vector<8x16xf32> to vector<8x16xbf16>
    %145 = vector.extract_strided_slice %37 {offsets = [8, 0], sizes = [8, 16], strides = [1, 1]} : vector<16x64xf32> to vector<8x16xf32>
    %146 = arith.truncf %145 : vector<8x16xf32> to vector<8x16xbf16>
    %cst_53 = arith.constant dense<0.000000e+00> : vector<8x8xf32>
    %147 = tpu.matmul %142, %144, %cst_53 {dimension_numbers = #tpu.dot_dimension_numbers<[1], [1], [0], [0], [0, 0, 1, 0], [], []>} : vector<8x16xbf16>, vector<8x16xbf16>, vector<8x8xf32> -> vector<8x8xf32>
    %cst_54 = arith.constant 2.500000e-01 : f32
    %148 = vector.broadcast %cst_54 : f32 to vector<8x8xf32>
    %149 = arith.mulf %147, %148 : vector<8x8xf32>
    %150 = arith.addf %149, %51 : vector<8x8xf32>
    %cst_55 = arith.constant dense<0xFF800000> : vector<8xf32>
    %151 = vector.multi_reduction <maximumf>, %150, %cst_55 [1] : vector<8x8xf32> to vector<8xf32>
    %152 = vector.shape_cast %151 : vector<8xf32> to vector<8x1xf32>
    %153 = vector.broadcast %152 : vector<8x1xf32> to vector<8x8xf32>
    %154 = arith.subf %150, %153 : vector<8x8xf32>
    %155 = math.exp %154 : vector<8x8xf32>
    %cst_56 = arith.constant dense<0.000000e+00> : vector<8xf32>
    %156 = vector.multi_reduction <add>, %155, %cst_56 [1] : vector<8x8xf32> to vector<8xf32>
    %157 = vector.shape_cast %156 : vector<8xf32> to vector<8x1xf32>
    %158 = tpu.reciprocal %157 {approx = true} : vector<8x1xf32> -> vector<8x1xf32>
    %159 = vector.broadcast %158 : vector<8x1xf32> to vector<8x8xf32>
    %160 = arith.mulf %155, %159 : vector<8x8xf32>
    %161 = arith.truncf %160 : vector<8x8xf32> to vector<8x8xbf16>
    %cst_57 = arith.constant dense<0.000000e+00> : vector<8x16xf32>
    %162 = tpu.matmul %161, %146, %cst_57 {dimension_numbers = #tpu.dot_dimension_numbers<[1], [0], [0], [1], [0, 0, 1, 1], [], []>} : vector<8x8xbf16>, vector<8x16xbf16>, vector<8x16xf32> -> vector<8x16xf32>
    %163 = vector.extract_strided_slice %45 {offsets = [8, 16], sizes = [8, 16], strides = [1, 1]} : vector<16x64xf32> to vector<8x16xf32>
    %164 = arith.truncf %163 : vector<8x16xf32> to vector<8x16xbf16>
    %165 = vector.extract_strided_slice %50 {offsets = [8, 16], sizes = [8, 16], strides = [1, 1]} : vector<16x64xf32> to vector<8x16xf32>
    %166 = arith.truncf %165 : vector<8x16xf32> to vector<8x16xbf16>
    %167 = vector.extract_strided_slice %37 {offsets = [8, 16], sizes = [8, 16], strides = [1, 1]} : vector<16x64xf32> to vector<8x16xf32>
    %168 = arith.truncf %167 : vector<8x16xf32> to vector<8x16xbf16>
    %cst_58 = arith.constant dense<0.000000e+00> : vector<8x8xf32>
    %169 = tpu.matmul %164, %166, %cst_58 {dimension_numbers = #tpu.dot_dimension_numbers<[1], [1], [0], [0], [0, 0, 1, 0], [], []>} : vector<8x16xbf16>, vector<8x16xbf16>, vector<8x8xf32> -> vector<8x8xf32>
    %cst_59 = arith.constant 2.500000e-01 : f32
    %170 = vector.broadcast %cst_59 : f32 to vector<8x8xf32>
    %171 = arith.mulf %169, %170 : vector<8x8xf32>
    %172 = arith.addf %171, %51 : vector<8x8xf32>
    %cst_60 = arith.constant dense<0xFF800000> : vector<8xf32>
    %173 = vector.multi_reduction <maximumf>, %172, %cst_60 [1] : vector<8x8xf32> to vector<8xf32>
    %174 = vector.shape_cast %173 : vector<8xf32> to vector<8x1xf32>
    %175 = vector.broadcast %174 : vector<8x1xf32> to vector<8x8xf32>
    %176 = arith.subf %172, %175 : vector<8x8xf32>
    %177 = math.exp %176 : vector<8x8xf32>
    %cst_61 = arith.constant dense<0.000000e+00> : vector<8xf32>
    %178 = vector.multi_reduction <add>, %177, %cst_61 [1] : vector<8x8xf32> to vector<8xf32>
    %179 = vector.shape_cast %178 : vector<8xf32> to vector<8x1xf32>
    %180 = tpu.reciprocal %179 {approx = true} : vector<8x1xf32> -> vector<8x1xf32>
    %181 = vector.broadcast %180 : vector<8x1xf32> to vector<8x8xf32>
    %182 = arith.mulf %177, %181 : vector<8x8xf32>
    %183 = arith.truncf %182 : vector<8x8xf32> to vector<8x8xbf16>
    %cst_62 = arith.constant dense<0.000000e+00> : vector<8x16xf32>
    %184 = tpu.matmul %183, %168, %cst_62 {dimension_numbers = #tpu.dot_dimension_numbers<[1], [0], [0], [1], [0, 0, 1, 1], [], []>} : vector<8x8xbf16>, vector<8x16xbf16>, vector<8x16xf32> -> vector<8x16xf32>
    %185 = vector.extract_strided_slice %45 {offsets = [8, 32], sizes = [8, 16], strides = [1, 1]} : vector<16x64xf32> to vector<8x16xf32>
    %186 = arith.truncf %185 : vector<8x16xf32> to vector<8x16xbf16>
    %187 = vector.extract_strided_slice %50 {offsets = [8, 32], sizes = [8, 16], strides = [1, 1]} : vector<16x64xf32> to vector<8x16xf32>
    %188 = arith.truncf %187 : vector<8x16xf32> to vector<8x16xbf16>
    %189 = vector.extract_strided_slice %37 {offsets = [8, 32], sizes = [8, 16], strides = [1, 1]} : vector<16x64xf32> to vector<8x16xf32>
    %190 = arith.truncf %189 : vector<8x16xf32> to vector<8x16xbf16>
    %cst_63 = arith.constant dense<0.000000e+00> : vector<8x8xf32>
    %191 = tpu.matmul %186, %188, %cst_63 {dimension_numbers = #tpu.dot_dimension_numbers<[1], [1], [0], [0], [0, 0, 1, 0], [], []>} : vector<8x16xbf16>, vector<8x16xbf16>, vector<8x8xf32> -> vector<8x8xf32>
    %cst_64 = arith.constant 2.500000e-01 : f32
    %192 = vector.broadcast %cst_64 : f32 to vector<8x8xf32>
    %193 = arith.mulf %191, %192 : vector<8x8xf32>
    %194 = arith.addf %193, %51 : vector<8x8xf32>
    %cst_65 = arith.constant dense<0xFF800000> : vector<8xf32>
    %195 = vector.multi_reduction <maximumf>, %194, %cst_65 [1] : vector<8x8xf32> to vector<8xf32>
    %196 = vector.shape_cast %195 : vector<8xf32> to vector<8x1xf32>
    %197 = vector.broadcast %196 : vector<8x1xf32> to vector<8x8xf32>
    %198 = arith.subf %194, %197 : vector<8x8xf32>
    %199 = math.exp %198 : vector<8x8xf32>
    %cst_66 = arith.constant dense<0.000000e+00> : vector<8xf32>
    %200 = vector.multi_reduction <add>, %199, %cst_66 [1] : vector<8x8xf32> to vector<8xf32>
    %201 = vector.shape_cast %200 : vector<8xf32> to vector<8x1xf32>
    %202 = tpu.reciprocal %201 {approx = true} : vector<8x1xf32> -> vector<8x1xf32>
    %203 = vector.broadcast %202 : vector<8x1xf32> to vector<8x8xf32>
    %204 = arith.mulf %199, %203 : vector<8x8xf32>
    %205 = arith.truncf %204 : vector<8x8xf32> to vector<8x8xbf16>
    %cst_67 = arith.constant dense<0.000000e+00> : vector<8x16xf32>
    %206 = tpu.matmul %205, %190, %cst_67 {dimension_numbers = #tpu.dot_dimension_numbers<[1], [0], [0], [1], [0, 0, 1, 1], [], []>} : vector<8x8xbf16>, vector<8x16xbf16>, vector<8x16xf32> -> vector<8x16xf32>
    %207 = vector.extract_strided_slice %45 {offsets = [8, 48], sizes = [8, 16], strides = [1, 1]} : vector<16x64xf32> to vector<8x16xf32>
    %208 = arith.truncf %207 : vector<8x16xf32> to vector<8x16xbf16>
    %209 = vector.extract_strided_slice %50 {offsets = [8, 48], sizes = [8, 16], strides = [1, 1]} : vector<16x64xf32> to vector<8x16xf32>
    %210 = arith.truncf %209 : vector<8x16xf32> to vector<8x16xbf16>
    %211 = vector.extract_strided_slice %37 {offsets = [8, 48], sizes = [8, 16], strides = [1, 1]} : vector<16x64xf32> to vector<8x16xf32>
    %212 = arith.truncf %211 : vector<8x16xf32> to vector<8x16xbf16>
    %cst_68 = arith.constant dense<0.000000e+00> : vector<8x8xf32>
    %213 = tpu.matmul %208, %210, %cst_68 {dimension_numbers = #tpu.dot_dimension_numbers<[1], [1], [0], [0], [0, 0, 1, 0], [], []>} : vector<8x16xbf16>, vector<8x16xbf16>, vector<8x8xf32> -> vector<8x8xf32>
    %cst_69 = arith.constant 2.500000e-01 : f32
    %214 = vector.broadcast %cst_69 : f32 to vector<8x8xf32>
    %215 = arith.mulf %213, %214 : vector<8x8xf32>
    %216 = arith.addf %215, %51 : vector<8x8xf32>
    %cst_70 = arith.constant dense<0xFF800000> : vector<8xf32>
    %217 = vector.multi_reduction <maximumf>, %216, %cst_70 [1] : vector<8x8xf32> to vector<8xf32>
    %218 = vector.shape_cast %217 : vector<8xf32> to vector<8x1xf32>
    %219 = vector.broadcast %218 : vector<8x1xf32> to vector<8x8xf32>
    %220 = arith.subf %216, %219 : vector<8x8xf32>
    %221 = math.exp %220 : vector<8x8xf32>
    %cst_71 = arith.constant dense<0.000000e+00> : vector<8xf32>
    %222 = vector.multi_reduction <add>, %221, %cst_71 [1] : vector<8x8xf32> to vector<8xf32>
    %223 = vector.shape_cast %222 : vector<8xf32> to vector<8x1xf32>
    %224 = tpu.reciprocal %223 {approx = true} : vector<8x1xf32> -> vector<8x1xf32>
    %225 = vector.broadcast %224 : vector<8x1xf32> to vector<8x8xf32>
    %226 = arith.mulf %221, %225 : vector<8x8xf32>
    %227 = arith.truncf %226 : vector<8x8xf32> to vector<8x8xbf16>
    %cst_72 = arith.constant dense<0.000000e+00> : vector<8x16xf32>
    %228 = tpu.matmul %227, %212, %cst_72 {dimension_numbers = #tpu.dot_dimension_numbers<[1], [0], [0], [1], [0, 0, 1, 1], [], []>} : vector<8x8xbf16>, vector<8x16xbf16>, vector<8x16xf32> -> vector<8x16xf32>
    %229 = tpu.concatenate %162, %184, %206, %228 in 1 : vector<8x16xf32>, vector<8x16xf32>, vector<8x16xf32>, vector<8x16xf32> -> vector<8x64xf32>
    %230 = tpu.concatenate %140, %229 in 0 : vector<8x64xf32>, vector<8x64xf32> -> vector<16x64xf32>
    %231 = arith.truncf %230 : vector<16x64xf32> to vector<16x64xbf16>
    %c0_73 = arith.constant 0 : index
    %c0_74 = arith.constant 0 : index
    %232 = vector.load %arg4[%c0_73, %c0_74] : memref<64x64xbf16, #tpu.memory_space<vmem>>, vector<64x64xbf16>
    %cst_75 = arith.constant dense<0.000000e+00> : vector<16x64xf32>
    %233 = tpu.matmul %231, %232, %cst_75 {dimension_numbers = #tpu.dot_dimension_numbers<[1], [0], [0], [1], [0, 0, 1, 1], [], []>} : vector<16x64xbf16>, vector<64x64xbf16>, vector<16x64xf32> -> vector<16x64xf32>
    %234 = arith.addf %0, %233 : vector<16x64xf32>
    %235 = arith.mulf %234, %234 : vector<16x64xf32>
    %cst_76 = arith.constant dense<0.000000e+00> : vector<16xf32>
    %236 = vector.multi_reduction <add>, %235, %cst_76 [1] : vector<16x64xf32> to vector<16xf32>
    %237 = vector.shape_cast %236 : vector<16xf32> to vector<16x1xf32>
    %cst_77 = arith.constant 6.400000e+01 : f32
    %238 = vector.broadcast %cst_77 : f32 to vector<16x1xf32>
    %239 = arith.divf %237, %238 : vector<16x1xf32>
    %cst_78 = arith.constant 9.99999974E-6 : f32
    %240 = vector.broadcast %cst_78 : f32 to vector<16x1xf32>
    %241 = arith.addf %239, %240 : vector<16x1xf32>
    %242 = math.rsqrt %241 : vector<16x1xf32>
    %243 = vector.broadcast %242 : vector<16x1xf32> to vector<16x64xf32>
    %244 = arith.mulf %234, %243 : vector<16x64xf32>
    %c0_79 = arith.constant 0 : index
    %c0_80 = arith.constant 0 : index
    %245 = vector.load %arg2[%c0_79, %c0_80] : memref<1x64xf32, #tpu.memory_space<vmem>>, vector<1x64xf32>
    %246 = vector.broadcast %245 : vector<1x64xf32> to vector<16x64xf32>
    %247 = arith.mulf %244, %246 : vector<16x64xf32>
    %248 = arith.truncf %247 : vector<16x64xf32> to vector<16x64xbf16>
    %c0_81 = arith.constant 0 : index
    %c0_82 = arith.constant 0 : index
    %249 = vector.load %arg5[%c0_81, %c0_82] : memref<64x256xbf16, #tpu.memory_space<vmem>>, vector<64x256xbf16>
    %cst_83 = arith.constant dense<0.000000e+00> : vector<16x256xf32>
    %250 = tpu.matmul %248, %249, %cst_83 {dimension_numbers = #tpu.dot_dimension_numbers<[1], [0], [0], [1], [0, 0, 1, 1], [], []>} : vector<16x64xbf16>, vector<64x256xbf16>, vector<16x256xf32> -> vector<16x256xf32>
    %251 = vector.extract_strided_slice %250 {offsets = [0, 0], sizes = [16, 128], strides = [1, 1]} : vector<16x256xf32> to vector<16x128xf32>
    %252 = vector.extract_strided_slice %250 {offsets = [0, 128], sizes = [16, 128], strides = [1, 1]} : vector<16x256xf32> to vector<16x128xf32>
    %cst_84 = arith.constant 0.000000e+00 : f32
    %253 = vector.broadcast %cst_84 : f32 to vector<16x128xf32>
    %254 = arith.subf %253, %251 : vector<16x128xf32>
    %255 = math.exp %254 : vector<16x128xf32>
    %cst_85 = arith.constant 1.000000e+00 : f32
    %256 = vector.broadcast %cst_85 : f32 to vector<16x128xf32>
    %257 = arith.addf %256, %255 : vector<16x128xf32>
    %258 = tpu.reciprocal %257 {approx = true} : vector<16x128xf32> -> vector<16x128xf32>
    %259 = arith.mulf %251, %258 : vector<16x128xf32>
    %260 = arith.mulf %259, %252 : vector<16x128xf32>
    %261 = arith.truncf %260 : vector<16x128xf32> to vector<16x128xbf16>
    %c0_86 = arith.constant 0 : index
    %c0_87 = arith.constant 0 : index
    %262 = vector.load %arg6[%c0_86, %c0_87] : memref<128x64xbf16, #tpu.memory_space<vmem>>, vector<128x64xbf16>
    %cst_88 = arith.constant dense<0.000000e+00> : vector<16x64xf32>
    %263 = tpu.matmul %261, %262, %cst_88 {dimension_numbers = #tpu.dot_dimension_numbers<[1], [0], [0], [1], [0, 0, 1, 1], [], []>} : vector<16x128xbf16>, vector<128x64xbf16>, vector<16x64xf32> -> vector<16x64xf32>
    %264 = arith.addf %234, %263 : vector<16x64xf32>
    %c0_89 = arith.constant 0 : index
    %c0_90 = arith.constant 0 : index
    %265 = vector.load %arg13[%c0_89, %c0_90] : memref<16x64xf32, #tpu.memory_space<vmem>>, vector<16x64xf32>
    tpu.vector_store %arg13[%c0_89, %c0_90], %264 {strides = array<i32>} : memref<16x64xf32, #tpu.memory_space<vmem>>, vector<16x64xf32>,
    return
  }
}

module attributes {stable_mosaic.version = 11 : i64} {
  func.func @_head_ce_kernel(%arg0: memref<16x64xf32, #tpu.memory_space<vmem>>, %arg1: memref<1x64xf32, #tpu.memory_space<vmem>>, %arg2: memref<64x128xbf16, #tpu.memory_space<vmem>>, %arg3: memref<16x1xi32, #tpu.memory_space<vmem>>, %arg4: memref<1x1xf32, #tpu.memory_space<vmem>>) attributes {dimension_semantics = [], scalar_prefetch = 0 : i64, scratch_operands = 0 : i64, tpu.core_type = #tpu.core_type<tc>} {
    %c0 = arith.constant 0 : index
    %c0_0 = arith.constant 0 : index
    %0 = vector.load %arg0[%c0, %c0_0] : memref<16x64xf32, #tpu.memory_space<vmem>>, vector<16x64xf32>
    %1 = arith.mulf %0, %0 : vector<16x64xf32>
    %cst = arith.constant dense<0.000000e+00> : vector<16xf32>
    %2 = vector.multi_reduction <add>, %1, %cst [1] : vector<16x64xf32> to vector<16xf32>
    %3 = vector.shape_cast %2 : vector<16xf32> to vector<16x1xf32>
    %cst_1 = arith.constant 6.400000e+01 : f32
    %4 = vector.broadcast %cst_1 : f32 to vector<16x1xf32>
    %5 = arith.divf %3, %4 : vector<16x1xf32>
    %cst_2 = arith.constant 9.99999974E-6 : f32
    %6 = vector.broadcast %cst_2 : f32 to vector<16x1xf32>
    %7 = arith.addf %5, %6 : vector<16x1xf32>
    %8 = math.rsqrt %7 : vector<16x1xf32>
    %9 = vector.broadcast %8 : vector<16x1xf32> to vector<16x64xf32>
    %10 = arith.mulf %0, %9 : vector<16x64xf32>
    %c0_3 = arith.constant 0 : index
    %c0_4 = arith.constant 0 : index
    %11 = vector.load %arg1[%c0_3, %c0_4] : memref<1x64xf32, #tpu.memory_space<vmem>>, vector<1x64xf32>
    %12 = vector.broadcast %11 : vector<1x64xf32> to vector<16x64xf32>
    %13 = arith.mulf %10, %12 : vector<16x64xf32>
    %14 = arith.truncf %13 : vector<16x64xf32> to vector<16x64xbf16>
    %c0_5 = arith.constant 0 : index
    %c0_6 = arith.constant 0 : index
    %15 = vector.load %arg2[%c0_5, %c0_6] : memref<64x128xbf16, #tpu.memory_space<vmem>>, vector<64x128xbf16>
    %cst_7 = arith.constant dense<0.000000e+00> : vector<16x128xf32>
    %16 = tpu.matmul %14, %15, %cst_7 {dimension_numbers = #tpu.dot_dimension_numbers<[1], [0], [0], [1], [0, 0, 1, 1], [], []>} : vector<16x64xbf16>, vector<64x128xbf16>, vector<16x128xf32> -> vector<16x128xf32>
    %c0_8 = arith.constant 0 : index
    %c0_9 = arith.constant 0 : index
    %17 = vector.load %arg3[%c0_8, %c0_9] : memref<16x1xi32, #tpu.memory_space<vmem>>, vector<16x1xi32>
    %cst_10 = arith.constant dense<0xFF800000> : vector<16xf32>
    %18 = vector.multi_reduction <maximumf>, %16, %cst_10 [1] : vector<16x128xf32> to vector<16xf32>
    %19 = vector.shape_cast %18 : vector<16xf32> to vector<16x1xf32>
    %20 = vector.broadcast %19 : vector<16x1xf32> to vector<16x128xf32>
    %21 = arith.subf %16, %20 : vector<16x128xf32>
    %22 = math.exp %21 : vector<16x128xf32>
    %cst_11 = arith.constant dense<0.000000e+00> : vector<16xf32>
    %23 = vector.multi_reduction <add>, %22, %cst_11 [1] : vector<16x128xf32> to vector<16xf32>
    %24 = vector.shape_cast %23 : vector<16xf32> to vector<16x1xf32>
    %25 = math.log %24 : vector<16x1xf32>
    %26 = arith.addf %19, %25 : vector<16x1xf32>
    %27 = tpu.iota {dimensions = array<i32: 1>} : vector<16x128xi32>
    %28 = vector.broadcast %17 : vector<16x1xi32> to vector<16x128xi32>
    %29 = arith.cmpi eq, %27, %28 : vector<16x128xi32>
    %cst_12 = arith.constant 0.000000e+00 : f32
    %30 = vector.broadcast %cst_12 : f32 to vector<16x128xf32>
    %31 = arith.select %29, %16, %30 : vector<16x128xi1>, vector<16x128xf32>
    %cst_13 = arith.constant dense<0.000000e+00> : vector<16xf32>
    %32 = vector.multi_reduction <add>, %31, %cst_13 [1] : vector<16x128xf32> to vector<16xf32>
    %33 = vector.shape_cast %32 : vector<16xf32> to vector<16x1xf32>
    %34 = arith.subf %26, %33 : vector<16x1xf32>
    %c0_i32 = arith.constant 0 : i32
    %35 = vector.broadcast %c0_i32 : i32 to vector<16x1xi32>
    %36 = arith.cmpi ne, %17, %35 : vector<16x1xi32>
    %37 = arith.extui %36 : vector<16x1xi1> to vector<16x1xi32>
    %38 = arith.sitofp %37 : vector<16x1xi32> to vector<16x1xf32>
    %39 = arith.mulf %34, %38 : vector<16x1xf32>
    %cst_14 = arith.constant dense<0.000000e+00> : vector<1xf32>
    %40 = vector.multi_reduction <add>, %39, %cst_14 [0] : vector<16x1xf32> to vector<1xf32>
    %41 = vector.shape_cast %40 : vector<1xf32> to vector<1x1xf32>
    %cst_15 = arith.constant dense<0.000000e+00> : vector<1xf32>
    %42 = vector.multi_reduction <add>, %38, %cst_15 [0] : vector<16x1xf32> to vector<1xf32>
    %43 = vector.shape_cast %42 : vector<1xf32> to vector<1x1xf32>
    %cst_16 = arith.constant 1.000000e+00 : f32
    %44 = vector.broadcast %cst_16 : f32 to vector<1x1xf32>
    %45 = arith.maximumf %43, %44 : vector<1x1xf32>
    %46 = arith.divf %41, %45 : vector<1x1xf32>
    %c0_17 = arith.constant 0 : index
    %c0_18 = arith.constant 0 : index
    %47 = vector.load %arg4[%c0_17, %c0_18] : memref<1x1xf32, #tpu.memory_space<vmem>>, vector<1x1xf32>
    tpu.vector_store %arg4[%c0_17, %c0_18], %46 {strides = array<i32>} : memref<1x1xf32, #tpu.memory_space<vmem>>, vector<1x1xf32>,
    return
  }
}

</mosaic_0001>

<bundles_post_ra>
// kernel: tile.23
= control target key start
LH: loop header
LB: loop body
LE: loop exit
PB: predicated region body
PF: predicated region fallthrough
CT: control target
= control target key end

     0   :  { %s22_s0 = inlined_call_operand.vmem [shape: f32[2], index: 0, kind: input, shape index: {}]   ;;  %s23_s1 = inlined_call_operand.vmem [shape: f32[8,2], index: 1, kind: output, shape index: {}]  }
   0x1   :  { %v4_v0 = vld [vmem:[%s22_s0] ss:$0 sm:$0xff] }
   0x2   :  { %5 = vst [vmem:[%s23_s1] sm:$0xff] %v4_v0 }

// kernel: llama_adapter_forward.6
= control target key start
LH: loop header
LB: loop body
LE: loop exit
PB: predicated region body
PF: predicated region fallthrough
CT: control target
= control target key end

     0   :  { %vm36_vm0 = vcmask 7168   ;;  %v1014_v0 = vmov 0   ;;  %v1015_v20 = vmov 0.0   ;;  %vm1016_vm1 = vmmov 0   ;;  %s1214_s1 = inlined_call_operand.vmem [shape: f32[16,1], index: 1, kind: input, shape index: {}]   ;;  %s1215_s2 = inlined_call_operand.vmem [shape: bf16[64,16], index: 2, kind: input, shape index: {}]   ;;  %s1216_s0 = inlined_call_operand.vmem [shape: f32[16,64], index: 0, kind: input, shape index: {}]   ;;  %s1217_s3 = inlined_call_operand.vmem [shape: bf16[16,3072], index: 3, kind: input, shape index: {}]   ;;  %s1218_s4 = inlined_call_operand.vmem [shape: f32[2,3072], index: 4, kind: output, shape index: {}]  }
   0x1   :  { %1004 = vset.pattern.permute.xlu0 %v1014_v0  ;;  %v20_v1 = vld [vmem:[%s1214_s1] sm:$0xff]  ;;  %v21_v2 = vld [vmem:[%s1214_s1 + $0x8] sm:$0xff]  ;;  %1005 = vset.pattern.permute.xlu1 %v1014_v0  ;;  %v1008_v22 = vld [vmem:[%s1215_s2 + $0x10] sm:$0xff]   ;;  %vm28_vm2 = vcmask 523264   ;;  %vm80_vm3 = vcmask 1040384   ;;  %vm304_vm4 = vcmask 130048  }
   0x2   :  { %24 = vperm.xlu0 %1004, %v20_v1   ;;  %v37_v3 = vsel %vm36_vm0, %v20_v1, 0.0  ;;  %v65_v4 = vsel %vm36_vm0, %v21_v2, 0.0  ;;  %340 = vmatprep.mubr.bf16.mxu1 %v1014_v0  ;;  %v1006_v19 = vld [vmem:[%s1215_s2] sm:$0xff]   ;;  %v1007_v21 = vld [vmem:[%s1215_s2 + $0x8] sm:$0xff]   ;;  %v1009_v23 = vld [vmem:[%s1215_s2 + $0x18] sm:$0xff]  }
   0x3   :  { %v38_v5 = vrot.slane %v37_v3, 4  ;;  %v66_v6 = vrot.slane %v65_v4, 4  ;;  %988 = vmatprep.subr.bf16.mxu0 %v1015_v20  ;;  %996 = vmatprep.mubr.msk.bf16.mxu0 %vm1016_vm1, %v1015_v20  ;;  %v18_v24 = vld [vmem:[%s1216_s0] sm:$0xff]  ;;  %v19_v27 = vld [vmem:[%s1216_s0 + $0x8] sm:$0xff]  ;;  %v163_v54 = vld [vmem:[%s1217_s3 + $0x18] sm:$0xff] }
   0x4   :  { %989 = vmatpush3.bf16.msra.mxu0 %v1006_v19  ;;  %v160_v52 = vld [vmem:[%s1217_s3] sm:$0xff]  ;;  %v175_v56 = vld [vmem:[%s1217_s3 + $0x78] sm:$0xff]  ;;  %v161_v60 = vld [vmem:[%s1217_s3 + $0x8] sm:$0xff] }
   0x5   :  { %v39_v7 = vadd.f32 %v38_v5, %v37_v3  ;;  %v67_v8 = vadd.f32 %v66_v6, %v65_v4  ;;  %990 = vmatprep.subr.bf16.mxu0 %v1015_v20  ;;  %v172_v53 = vld [vmem:[%s1217_s3 + $0x60] sm:$0xff]  ;;  %v953_v58 = vcombine.low %v163_v54, %v175_v56  ;;  %v954_v59 = vcombine.high %v163_v54, %v175_v56  ;;  %v173_v61 = vld [vmem:[%s1217_s3 + $0x68] sm:$0xff]  ;;  %v162_v6 = vld [vmem:[%s1217_s3 + $0x10] sm:$0xff] }
   0x6   :  { %54 = vperm.xlu0 %1004, %v21_v2   ;;  %v948_v55 = vcombine.high %v160_v52, %v172_v53  ;;  %v947_v57 = vcombine.low %v160_v52, %v172_v53  ;;  %v949_v62 = vcombine.low %v161_v60, %v173_v61  ;;  %v950_v63 = vcombine.high %v161_v60, %v173_v61  ;;  %v165_v1 = vld [vmem:[%s1217_s3 + $0x28] sm:$0xff] }
   0x7   :  { %v40_v9 = vrot.slane %v39_v7, 2  ;;  %v68_v10 = vrot.slane %v67_v8, 2  ;;  %v177_v2 = vld [vmem:[%s1217_s3 + $0x88] sm:$0xff] }
   0x8   :  { %991 = vmatpush3.bf16.msra.mxu0 %v1007_v21  ;;  %308 = vmatprep.subr.bf16.mxu1 %v948_v55  ;;  %v957_v3 = vcombine.low %v165_v1, %v177_v2  ;;  %v958_v4 = vcombine.high %v165_v1, %v177_v2  ;;  %v169_v19 = vld [vmem:[%s1217_s3 + $0x48] sm:$0xff] }
   0x9   :  { %v69_v11 = vadd.f32 %v68_v10, %v67_v8  ;;  %v41_v12 = vadd.f32 %v40_v9, %v39_v7  ;;  %992 = vmatprep.subr.bf16.mxu0 %v1015_v20  ;;  %309 = vmatpush1.bf16.msra.mxu1 %v947_v57  ;;  %v174_v7 = vld [vmem:[%s1217_s3 + $0x70] sm:$0xff]  ;;  %v167_v10 = vld [vmem:[%s1217_s3 + $0x38] sm:$0xff] }
   0xa   :  { %349 = vmatprep.subr.bf16.mxu1 %v950_v63  ;;  %v951_v21 = vcombine.low %v162_v6, %v174_v7 }
   0xb   :  { %v42_v13 = vrot.slane %v41_v12, 1  ;;  %v70_v14 = vrot.slane %v69_v11, 1 }
   0xc   :  { %993 = vmatpush3.bf16.msra.mxu0 %v1008_v22 }
   0xd   :  { %v43_v15 = vadd.f32 %v42_v13, %v41_v12  ;;  %v71_v16 = vadd.f32 %v70_v14, %v69_v11  ;;  %994 = vmatprep.subr.bf16.mxu0 %v1015_v20  ;;  %v179_v11 = vld [vmem:[%s1217_s3 + $0x98] sm:$0xff]  ;;  %v181_v20 = vld [vmem:[%s1217_s3 + $0xa8] sm:$0xff] }
   0xe   :  { %v961_v22 = vcombine.low %v167_v10, %v179_v11 }
   0xf   :  { %v44_v17 = vmax.f32 %v43_v15, 1.0  ;;  %v72_v18 = vmax.f32 %v71_v16, 1.0  ;;  %v952_v15 = vcombine.high %v162_v6, %v174_v7  ;;  %v962_v16 = vcombine.high %v167_v10, %v179_v11 }
  0x10   :  { %995 = vmatpush3.bf16.msra.mxu0 %v1009_v23 }
  0x11   :  { %47 = vperm.xlu1 %1005, %v44_v17   ;;  %431 = vmatprep.subr.bf16.mxu0 %v954_v59  ;;  %v164_v17 = vld [vmem:[%s1217_s3 + $0x20] sm:$0xff] }
  0x15   :  { %75 = vperm.xlu1 %1005, %v72_v18   ;;  %v176_v18 = vld [vmem:[%s1217_s3 + $0x80] sm:$0xff] }
  0x16   :  { %v956_v23 = vcombine.high %v164_v17, %v176_v18 }
  0x81   :  { %v25_v25 = vpop.permute.xlu0 %24 }
  0x82   :  { %v27_v26 = vmul.f32 %v25_v25, %v18_v24  ;;  %v966_v24 = vcombine.high %v169_v19, %v181_v20  ;;  %v166_v25 = vld [vmem:[%s1217_s3 + $0x30] sm:$0xff] }
  0x84   :  { %v29_v30 = vsel %vm28_vm2, %v27_v26, 0.0  ;;  %v178_v26 = vld [vmem:[%s1217_s3 + $0x90] sm:$0xff] }
  0x85   :  { %v55_v28 = vpop.permute.xlu0 %54  ;;  %v30_v32 = vrot.slane %v29_v30, 4 }
  0x86   :  { %v57_v29 = vmul.f32 %v55_v28, %v19_v27  ;;  %v171_v27 = vld [vmem:[%s1217_s3 + $0x58] sm:$0xff] }
  0x87   :  { %v31_v34 = vadd.f32 %v30_v32, %v29_v30  ;;  %v183_v28 = vld [vmem:[%s1217_s3 + $0xb8] sm:$0xff]  ;;  %v965_v30 = vcombine.low %v169_v19, %v181_v20 }
  0x88   :  { %v58_v31 = vsel %vm28_vm2, %v57_v29, 0.0  ;;  %v955_v29 = vcombine.low %v164_v17, %v176_v18  ;;  %v970_v32 = vcombine.high %v171_v27, %v183_v28 }
  0x89   :  { %v59_v33 = vrot.slane %v58_v31, 4  ;;  %v32_v37 = vrot.slane %v31_v34, 2 }
  0x8b   :  { %v60_v35 = vadd.f32 %v59_v33, %v58_v31  ;;  %v33_v40 = vadd.f32 %v32_v37, %v31_v34  ;;  %v960_v31 = vcombine.high %v166_v25, %v178_v26  ;;  %v168_v33 = vld [vmem:[%s1217_s3 + $0x40] sm:$0xff] }
  0x8c   :  { %v180_v34 = vld [vmem:[%s1217_s3 + $0xa0] sm:$0xff] }
  0x8d   :  { %v61_v38 = vrot.slane %v60_v35, 2  ;;  %v34_v42 = vrot.slane %v33_v40, 1  ;;  %v964_v37 = vcombine.high %v168_v33, %v180_v34 }
  0x8f   :  { %v62_v41 = vadd.f32 %v61_v38, %v60_v35  ;;  %v35_v45 = vadd.f32 %v34_v42, %v33_v40  ;;  %v959_v35 = vcombine.low %v166_v25, %v178_v26  ;;  %v170_v38 = vld [vmem:[%s1217_s3 + $0x50] sm:$0xff]  ;;  %v963_v40 = vcombine.low %v168_v33, %v180_v34 }
  0x90   :  { %v48_v36 = vpop.permute.xlu1 %47 }
  0x91   :  { %1010 = vrcp.f32 %v48_v36  ;;  %v63_v43 = vrot.slane %v62_v41, 1  ;;  %v969_v36 = vcombine.low %v171_v27, %v183_v28 }
  0x93   :  { %v64_v46 = vadd.f32 %v63_v43, %v62_v41 }
  0x94   :  { %v76_v39 = vpop.permute.xlu1 %75 }
  0x95   :  { %1012 = vrcp.f32 %v76_v39  ;;  %v182_v39 = vld [vmem:[%s1217_s3 + $0xb0] sm:$0xff] }
  0x96   :  { %v968_v41 = vcombine.high %v170_v38, %v182_v39  ;;  %v967_v42 = vcombine.low %v170_v38, %v182_v39 }
  0x9b   :  { %v1011_v44 = vpop.eup %1010 }
  0x9c   :  { %v51_v48 = vmul.f32 %v1011_v44, %v35_v45  ;;  %v1017_v45 = vmov 1983009808  }
  0x9f   :  { %v1013_v47 = vpop.eup %1012 }
  0xa0   :  { %v79_v49 = vmul.f32 %v1013_v47, %v64_v46  ;;  %v827_v46 = vunpack.c.l.s4 %v1017_v45  ;;  %v829_v47 = vlaneseq }
  0xa2   :  { %v81_v50 = vsel %vm80_vm3, %v51_v48, %v79_v49  ;;  %v828_v56 = vunpack.c.0.s8 %v827_v46  ;;  %v830_v57 = vshrl.u32 %v829_v47, 7 }
  0xa3   :  { %v82_v51 = vpack.c.bf16 %v81_v50, %v81_v50 }
  0xa5   :  { %997 = vmatmul.mubr.msk.bf16.vlgmr.msra.gmra.mrb[0].mxu0 %vm28_vm2, %v82_v51 }
  0xa6   :  { %463 = vmatprep.mubr.bf16.mxu0 %v1014_v0  ;;  %432 = vmatpush1.bf16.msra.mxu0 %v953_v58  ;;  %v1182_v58 = vsub.s32 %v828_v56, %v830_v57 }
  0xa7   :  { %513 = vmatprep.subr.bf16.mxu0 %v958_v4 }
 0x178   :  { %v152_v5 = vpop.f32.mrb[0].mxu0 }
 0x179   :  { %v158_v8 = vmax.f32 %v152_v5, 0.0  ;;  %v998_v9 = vpop.f32.mrb[1].mxu0 }
 0x17a   :  { %v155_v12 = vpop.f32.mrb[2].mxu0 }
 0x17b   :  { %v1110_v13 = vpack.c.bf16 %v158_v8, %v158_v8  ;;  %v999_v14 = vpop.f32.mrb[3].mxu0 }
 0x17d   :  { %971 = vmatmul.mubr.msk.bf16.vlgmr.msra.gmra.mrb[0].mxu1 %vm304_vm4, %v1110_v13  ;;  %974 = vmatmul.mubr.msk.bf16.vlgmr.msra.gmra.mrb[4].mxu0 %vm304_vm4, %v1110_v13 }
 0x17e   :  { %350 = vmatpush1.bf16.msra.mxu1 %v949_v62  ;;  %514 = vmatpush1.bf16.msra.mxu0 %v957_v3 }
 0x17f   :  { %381 = vmatprep.mubr.bf16.mxu1 %v1014_v0  ;;  %390 = vmatprep.subr.bf16.mxu1 %v952_v15 }
 0x180   :  { %545 = vmatprep.mubr.bf16.mxu0 %v1014_v0  ;;  %595 = vmatprep.subr.bf16.mxu0 %v962_v16 }
 0x185   :  { %972 = vmatmul.mubr.msk.bf16.vlgmr.msra.gmra.mrb[4].mxu1 %vm304_vm4, %v1110_v13  ;;  %976 = vmatmul.mubr.msk.bf16.vlgmr.msra.gmra.mrb[8].mxu0 %vm304_vm4, %v1110_v13 }
 0x186   :  { %391 = vmatpush1.bf16.msra.mxu1 %v951_v21  ;;  %596 = vmatpush1.bf16.msra.mxu0 %v961_v22 }
 0x187   :  { %422 = vmatprep.mubr.bf16.mxu1 %v1014_v0  ;;  %472 = vmatprep.subr.bf16.mxu1 %v956_v23 }
 0x188   :  { %627 = vmatprep.mubr.bf16.mxu0 %v1014_v0  ;;  %677 = vmatprep.subr.bf16.mxu0 %v966_v24 }
 0x18d   :  { %973 = vmatmul.mubr.msk.bf16.vlgmr.msra.gmra.mrb[8].mxu1 %vm304_vm4, %v1110_v13  ;;  %978 = vmatmul.mubr.msk.bf16.vlgmr.msra.gmra.mrb[12].mxu0 %vm304_vm4, %v1110_v13 }
 0x18e   :  { %473 = vmatpush1.bf16.msra.mxu1 %v955_v29  ;;  %678 = vmatpush1.bf16.msra.mxu0 %v965_v30 }
 0x18f   :  { %504 = vmatprep.mubr.bf16.mxu1 %v1014_v0  ;;  %554 = vmatprep.subr.bf16.mxu1 %v960_v31 }
 0x190   :  { %709 = vmatprep.mubr.bf16.mxu0 %v1014_v0  ;;  %759 = vmatprep.subr.bf16.mxu0 %v970_v32 }
 0x195   :  { %975 = vmatmul.mubr.msk.bf16.vlgmr.msra.gmra.mrb[12].mxu1 %vm304_vm4, %v1110_v13  ;;  %980 = vmatmul.mubr.msk.bf16.vlgmr.msra.gmra.mrb[16].mxu0 %vm304_vm4, %v1110_v13 }
 0x196   :  { %555 = vmatpush1.bf16.msra.mxu1 %v959_v35  ;;  %760 = vmatpush1.bf16.msra.mxu0 %v969_v36 }
 0x197   :  { %586 = vmatprep.mubr.bf16.mxu1 %v1014_v0  ;;  %636 = vmatprep.subr.bf16.mxu1 %v964_v37 }
 0x198   :  { %791 = vmatprep.mubr.bf16.mxu0 %v1014_v0 }
 0x19d   :  { %977 = vmatmul.mubr.msk.bf16.vlgmr.msra.gmra.mrb[16].mxu1 %vm304_vm4, %v1110_v13  ;;  %982 = vmatmul.mubr.msk.bf16.vlgmr.msra.gmra.mrb[20].mxu0 %vm304_vm4, %v1110_v13 }
 0x19e   :  { %637 = vmatpush1.bf16.msra.mxu1 %v963_v40  ;;  %668 = vmatprep.mubr.bf16.mxu1 %v1014_v0 }
 0x19f   :  { %718 = vmatprep.subr.bf16.mxu1 %v968_v41 }
 0x1a5   :  { %979 = vmatmul.mubr.msk.bf16.vlgmr.msra.gmra.mrb[20].mxu1 %vm304_vm4, %v1110_v13 }
 0x1a6   :  { %719 = vmatpush1.bf16.msra.mxu1 %v967_v42  ;;  %750 = vmatprep.mubr.bf16.mxu1 %v1014_v0 }
 0x1ad   :  { %981 = vmatmul.mubr.msk.bf16.vlgmr.msra.gmra.mrb[24].mxu1 %vm304_vm4, %v1110_v13 }
 0x250   :  { %v342_v43 = vpop.f32.mrb[0].mxu1  ;;  %v465_v44 = vpop.f32.mrb[4].mxu0 }
 0x251   :  { %v344_v48 = vpop.f32.mrb[1].mxu1  ;;  %v467_v49 = vpop.f32.mrb[5].mxu0 }
 0x252   :  { %v824_v50 = vcombine.low %v342_v43, %v344_v48  ;;  %v842_v51 = vcombine.low %v465_v44, %v467_v49  ;;  %v346_v52 = vpop.f32.mrb[2].mxu1  ;;  %v469_v53 = vpop.f32.mrb[6].mxu0 }
 0x253   :  { %v347_v54 = vpop.f32.mrb[3].mxu1  ;;  %v470_v55 = vpop.f32.mrb[7].mxu0 }
 0x254   :  { %v832_v5 = vrot.slane %v824_v50, %v1182_v58  ;;  %v856_v18 = vrot.slane %v842_v51, %v1182_v58 }
 0x258   :  { %v383_v0 = vpop.f32.mrb[4].mxu1  ;;  %v547_v59 = vpop.f32.mrb[8].mxu0 }
 0x259   :  { %v385_v60 = vpop.f32.mrb[5].mxu1  ;;  %v549_v61 = vpop.f32.mrb[9].mxu0 }
 0x25a   :  { %v825_v62 = vcombine.low %v383_v0, %v385_v60  ;;  %v859_v63 = vcombine.low %v547_v59, %v549_v61  ;;  %v387_v1 = vpop.f32.mrb[6].mxu1  ;;  %v551_v2 = vpop.f32.mrb[10].mxu0 }
 0x25b   :  { %v388_v3 = vpop.f32.mrb[7].mxu1  ;;  %v552_v4 = vpop.f32.mrb[11].mxu0 }
 0x25c   :  { %v839_v6 = vrot.slane %v825_v62, %v1182_v58  ;;  %v873_v31 = vrot.slane %v859_v63, %v1182_v58 }
 0x25e   :  { %v840_v7 = vcombine.low %v832_v5, %v839_v6 }
 0x260   :  { %932 = vst [vmem:[%s1218_s4] sm:$0xff] %v840_v7  ;;  %v424_v8 = vpop.f32.mrb[8].mxu1  ;;  %v629_v9 = vpop.f32.mrb[12].mxu0 }
 0x261   :  { %v426_v10 = vpop.f32.mrb[9].mxu1  ;;  %v631_v11 = vpop.f32.mrb[13].mxu0 }
 0x262   :  { %v841_v12 = vcombine.low %v424_v8, %v426_v10  ;;  %v876_v13 = vcombine.low %v629_v9, %v631_v11  ;;  %v428_v14 = vpop.f32.mrb[10].mxu1  ;;  %v633_v15 = vpop.f32.mrb[14].mxu0 }
 0x263   :  { %v429_v16 = vpop.f32.mrb[11].mxu1  ;;  %v634_v17 = vpop.f32.mrb[15].mxu0 }
 0x264   :  { %v849_v19 = vrot.slane %v841_v12, %v1182_v58  ;;  %v890_v44 = vrot.slane %v876_v13, %v1182_v58 }
 0x266   :  { %v857_v20 = vcombine.low %v849_v19, %v856_v18 }
 0x268   :  { %933 = vst [vmem:[%s1218_s4 + $0x8] sm:$0xff] %v857_v20  ;;  %v506_v21 = vpop.f32.mrb[12].mxu1  ;;  %v711_v22 = vpop.f32.mrb[16].mxu0 }
 0x269   :  { %v508_v23 = vpop.f32.mrb[13].mxu1  ;;  %v713_v24 = vpop.f32.mrb[17].mxu0 }
 0x26a   :  { %v858_v25 = vcombine.low %v506_v21, %v508_v23  ;;  %v893_v26 = vcombine.low %v711_v22, %v713_v24  ;;  %v510_v27 = vpop.f32.mrb[14].mxu1  ;;  %v715_v28 = vpop.f32.mrb[18].mxu0 }
 0x26b   :  { %v511_v29 = vpop.f32.mrb[15].mxu1  ;;  %v716_v30 = vpop.f32.mrb[19].mxu0 }
 0x26c   :  { %v866_v32 = vrot.slane %v858_v25, %v1182_v58  ;;  %v907_v52 = vrot.slane %v893_v26, %v1182_v58 }
 0x26e   :  { %v874_v33 = vcombine.low %v866_v32, %v873_v31 }
 0x270   :  { %934 = vst [vmem:[%s1218_s4 + $0x10] sm:$0xff] %v874_v33  ;;  %v588_v34 = vpop.f32.mrb[16].mxu1  ;;  %v793_v35 = vpop.f32.mrb[20].mxu0 }
 0x271   :  { %v590_v36 = vpop.f32.mrb[17].mxu1  ;;  %v795_v37 = vpop.f32.mrb[21].mxu0 }
 0x272   :  { %v875_v38 = vcombine.low %v588_v34, %v590_v36  ;;  %v910_v39 = vcombine.low %v793_v35, %v795_v37  ;;  %v592_v40 = vpop.f32.mrb[18].mxu1  ;;  %v797_v41 = vpop.f32.mrb[22].mxu0 }
 0x273   :  { %v593_v42 = vpop.f32.mrb[19].mxu1  ;;  %v798_v43 = vpop.f32.mrb[23].mxu0 }
 0x274   :  { %v883_v45 = vrot.slane %v875_v38, %v1182_v58  ;;  %v924_v60 = vrot.slane %v910_v39, %v1182_v58 }
 0x276   :  { %v891_v46 = vcombine.low %v883_v45, %v890_v44 }
 0x278   :  { %935 = vst [vmem:[%s1218_s4 + $0x18] sm:$0xff] %v891_v46  ;;  %v670_v47 = vpop.f32.mrb[20].mxu1 }
 0x279   :  { %v672_v48 = vpop.f32.mrb[21].mxu1 }
 0x27a   :  { %v892_v49 = vcombine.low %v670_v47, %v672_v48  ;;  %v674_v50 = vpop.f32.mrb[22].mxu1 }
 0x27b   :  { %v675_v51 = vpop.f32.mrb[23].mxu1 }
 0x27c   :  { %v900_v53 = vrot.slane %v892_v49, %v1182_v58 }
 0x27e   :  { %v908_v54 = vcombine.low %v900_v53, %v907_v52 }
 0x280   :  { %936 = vst [vmem:[%s1218_s4 + $0x20] sm:$0xff] %v908_v54  ;;  %v752_v55 = vpop.f32.mrb[24].mxu1 }
 0x281   :  { %v754_v56 = vpop.f32.mrb[25].mxu1 }
 0x282   :  { %v909_v57 = vcombine.low %v752_v55, %v754_v56  ;;  %v756_v0 = vpop.f32.mrb[26].mxu1 }
 0x283   :  { %v757_v59 = vpop.f32.mrb[27].mxu1 }
 0x284   :  { %v917_v61 = vrot.slane %v909_v57, %v1182_v58 }
 0x286   :  { %v925_v62 = vcombine.low %v917_v61, %v924_v60 }
 0x288   :  { %937 = vst [vmem:[%s1218_s4 + $0x28] sm:$0xff] %v925_v62 }

// kernel: llama_adapter_forward.9
= control target key start
LH: loop header
LB: loop body
LE: loop exit
PB: predicated region body
PF: predicated region fallthrough
CT: control target
= control target key end

     0   :  { %vm23_vm0 = vcmask 523264   ;;  %s366_s0 = inlined_call_operand.vmem [shape: f32[16,64], index: 0, kind: input, shape index: {}]   ;;  %s367_s1 = inlined_call_operand.vmem [shape: f32[1,64], index: 1, kind: input, shape index: {}]   ;;  %s368_s2 = inlined_call_operand.vmem [shape: bf16[64,128], index: 2, kind: input, shape index: {}]   ;;  %s369_s3 = inlined_call_operand.vmem [shape: s32[16,1], index: 3, kind: input, shape index: {}]   ;;  %s370_s4 = inlined_call_operand.hbm [shape: f32[1,1], index: 4, kind: output, shape index: {}]  }
   0x1   :  { %v19_v0 = vld [vmem:[%s366_s0] sm:$0xff]  ;;  %v20_v1 = vld [vmem:[%s366_s0 + $0x8] sm:$0xff] }
   0x2   :  { %v21_v2 = vmul.f32 %v19_v0, %v19_v0  ;;  %v22_v3 = vmul.f32 %v20_v1, %v20_v1 }
   0x4   :  { %v24_v4 = vsel %vm23_vm0, %v21_v2, 0.0 }
   0x5   :  { %9 = vsyncpa [#allocation3], 0  ;;  %25 = vadd.xlane.f32.xlu0 %v24_v4  ;;  %v27_v5 = vsel %vm23_vm0, %v22_v3, 0.0  ;;  %v242_v6 = vld [vmem:[%s368_s2] sm:$0xff]   ;;  %v284_v7 = vmov 0.0   ;;  %vm285_vm1 = vmmov 0   ;;  %v147_v38 = vlaneseq }
   0x6   :  { %224 = vmatprep.subr.bf16.mxu0 %v284_v7  ;;  %232 = vmatprep.mubr.msk.bf16.mxu0 %vm285_vm1, %v284_v7  ;;  %v243_v8 = vld [vmem:[%s368_s2 + $0x8] sm:$0xff]   ;;  %v244_v9 = vld [vmem:[%s368_s2 + $0x10] sm:$0xff]   ;;  %v245_v10 = vld [vmem:[%s368_s2 + $0x18] sm:$0xff]   ;;  %v286_v12 = vmov 0   ;;  %vm173_vm6 = vcmask 7168   ;;  %vm195_vm7 = vcmask 0  }
   0x7   :  { %225 = vmatpush3.bf16.msra.mxu0 %v242_v6  ;;  %v125_v11 = vld [vmem:[%s369_s3] sm:$0xff]  ;;  %240 = vset.pattern.permute.xlu0 %v286_v12  ;;  %v126_v31 = vld [vmem:[%s369_s3 + $0x8] sm:$0xff]  ;;  %v148_v39 = vand.u32 127, %v147_v38 }
   0x8   :  { %226 = vmatprep.subr.bf16.mxu0 %v284_v7  ;;  %241 = vset.pattern.permute.xlu1 %v286_v12  ;;  %v211_v22 = vld [vmem:[%s367_s1] ss:$0 sm:$0xff]  ;;  %vm165_vm4 = vcmp.ne.s32.totalorder %v125_v11, 0  ;;  %vm166_vm5 = vcmp.ne.s32.totalorder %v126_v31, 0  ;;  %s287_s1 = smov [#allocation2]  }
   0x9   :  { %28 = vadd.xlane.f32.xlu0 %v27_v5  ;;  %v217_v46 = vsel %vm165_vm4, 1.0, %v284_v7  ;;  %v218_v47 = vsel %vm166_vm5, 1.0, %v284_v7  ;;  %s203_s3 = sshll.u32 %s287_s1, 4  ;;  %s204_s3 = int_to_ptr.vmem [resolvable:$true] %s203_s3 }
   0xa   :  { %v183_v48 = vsel %vm173_vm6, %v217_v46, 0.0  ;;  %v184_v49 = vsel %vm173_vm6, %v218_v47, 0.0  ;;  %s260_s5 = scalar_lea.vmem %s204_s3, 16  ;;  %s264_s6 = scalar_lea.vmem %s204_s3, 32 }
   0xb   :  { %227 = vmatpush3.bf16.msra.mxu0 %v243_v8  ;;  %v185_v50 = vadd.f32 %v184_v49, %v183_v48  ;;  %p261_p0 = scmp.ne.s32.totalorder %s204_s3, %s260_s5  ;;  %p265_p1 = scmp.lt.s32.totalorder %s204_s3, %s204_s3 }
   0xc   :  { %228 = vmatprep.subr.bf16.mxu0 %v284_v7  ;;  %p266_p2 = scmp.lt.s32.totalorder %s264_s6, %s260_s5 }
   0xd   :  { %v186_v51 = vrot.slane %v185_v50, 4 }
   0xe   :  { %p267_p3 = por %p266_p2, %p265_p1 }
   0xf   :  { %229 = vmatpush3.bf16.msra.mxu0 %v244_v9  ;;  %v187_v53 = vadd.f32 %v186_v51, %v185_v50 }
  0x10   :  { %230 = vmatprep.subr.bf16.mxu0 %v284_v7  ;;  %p268_p4 = pnand %p267_p3, %p261_p0 }
  0x11   :  { %v188_v55 = vrot.slane %v187_v53, 2 }
  0x13   :  { %231 = vmatpush3.bf16.msra.mxu0 %v245_v10  ;;  %v189_v56 = vadd.f32 %v188_v55, %v187_v53 }
  0x15   :  { %v190_v61 = vrot.slane %v189_v56, 1 }
  0x1f   :  { %150 = vperm.xlu0 %240, %v125_v11  }
  0x92   :  { %v26_v13 = vpop.xlane.xlu0 %25 }
  0x93   :  { %v31_v14 = vmul.f32 0.015625, %v26_v13 }
  0x95   :  { %v33_v15 = vadd.f32 1e-05, %v31_v14 }
  0x96   :  { %v29_v16 = vpop.xlane.xlu0 %28 }
  0x97   :  { %246 = vrsqrt.f32 %v33_v15  ;;  %v32_v17 = vmul.f32 0.015625, %v29_v16 }
  0x99   :  { %v34_v18 = vadd.f32 1e-05, %v32_v17 }
  0x9b   :  { %248 = vrsqrt.f32 %v34_v18 }
  0x9e   :  { %v151_v40 = vpop.permute.xlu0 %150 }
  0x9f   :  { %vm155_vm2 = vcmp.eq.s32.totalorder %v148_v39, %v151_v40 }
  0xa1   :  { %v247_v19 = vpop.eup %246 }
  0xa2   :  { %v37_v20 = vmul.f32 %v247_v19, %v19_v0 }
  0xa4   :  { %v46_v24 = vmul.f32 %v211_v22, %v37_v20 }
  0xa5   :  { %v249_v21 = vpop.eup %248 }
  0xa6   :  { %v38_v23 = vmul.f32 %v249_v21, %v20_v1  ;;  %v191_v1 = vadd.f32 %v190_v61, %v189_v56 }
  0xa8   :  { %v47_v25 = vmul.f32 %v211_v22, %v38_v23  ;;  %v192_v6 = vmax.f32 %v191_v1, 1.0 }
  0xaa   :  { %v48_v26 = vpack.c.bf16 %v47_v25, %v46_v24 }
  0xac   :  { %233 = vmatmul.mubr.msk.bf16.vlgmr.msra.gmra.mrb[0].mxu0 %vm23_vm0, %v48_v26 }
 0x17f   :  { %v118_v27 = vpop.f32.mrb[0].mxu0 }
 0x180   :  { %127 = vmax.xlane.f32.xlu1 %v118_v27  ;;  %v234_v28 = vpop.f32.mrb[1].mxu0  ;;  %v157_v44 = vsel %vm155_vm2, %v118_v27, 0.0 }
 0x181   :  { %v121_v29 = vpop.f32.mrb[2].mxu0 }
 0x182   :  { %v235_v30 = vpop.f32.mrb[3].mxu0 }
 0x184   :  { %129 = vmax.xlane.f32.xlu1 %v121_v29 }
 0x195   :  { %153 = vperm.xlu1 %241, %v126_v31  }
 0x20d   :  { %v128_v32 = vpop.xlane.xlu1 %127 }
 0x20e   :  { %v131_v33 = vsub.f32 %v118_v27, %v128_v32 }
 0x210   :  { %v133_v34 = vmul.f32 1.442695, %v131_v33 }
 0x211   :  { %v130_v35 = vpop.xlane.xlu1 %129 }
 0x212   :  { %250 = vpow2.f32 %v133_v34  ;;  %v132_v36 = vsub.f32 %v121_v29, %v130_v35 }
 0x214   :  { %v135_v37 = vmul.f32 1.442695, %v132_v36 }
 0x215   :  { %v154_v42 = vpop.permute.xlu1 %153 }
 0x216   :  { %252 = vpow2.f32 %v135_v37  ;;  %vm156_vm3 = vcmp.eq.s32.totalorder %v148_v39, %v154_v42 }
 0x217   :  { %v158_v45 = vsel %vm156_vm3, %v121_v29, 0.0 }
 0x21c   :  { %v251_v41 = vpop.eup %250 }
 0x21d   :  { %137 = vadd.xlane.f32.xlu1 %v251_v41 }
 0x220   :  { %v253_v43 = vpop.eup %252 }
 0x221   :  { %139 = vadd.xlane.f32.xlu0 %v253_v43  ;;  %159 = vadd.xlane.f32.xlu1 %v157_v44 }
 0x225   :  { %161 = vadd.xlane.f32.xlu1 %v158_v45 }
 0x2aa   :  { %v138_v52 = vpop.xlane.xlu1 %137 }
 0x2ab   :  { %254 = vlog2.f32 %v138_v52 }
 0x2ae   :  { %v140_v54 = vpop.xlane.xlu0 %139  ;;  %v160_v59 = vpop.xlane.xlu1 %159 }
 0x2af   :  { %256 = vlog2.f32 %v140_v54 }
 0x2b0   :  { %258 = vrcp.f32 %v192_v6 }
 0x2b2   :  { %v162_v3 = vpop.xlane.xlu1 %161 }
 0x2b5   :  { %v255_v57 = vpop.eup %254 }
 0x2b6   :  { %v142_v58 = vmul.f32 0.6931472, %v255_v57 }
 0x2b8   :  { %v145_v60 = vadd.f32 %v142_v58, %v128_v32 }
 0x2b9   :  { %v257_v62 = vpop.eup %256 }
 0x2ba   :  { %v163_v63 = vsub.f32 %v145_v60, %v160_v59  ;;  %v144_v0 = vmul.f32 0.6931472, %v257_v62  ;;  %v259_v16 = vpop.eup %258 }
 0x2bc   :  { %v146_v2 = vadd.f32 %v144_v0, %v130_v35  ;;  %v171_v4 = vmul.f32 %v217_v46, %v163_v63 }
 0x2be   :  { %v164_v5 = vsub.f32 %v146_v2, %v162_v3  ;;  %v174_v8 = vsel %vm173_vm6, %v171_v4, 0.0 }
 0x2c0   :  { %v172_v7 = vmul.f32 %v218_v47, %v164_v5 }
 0x2c2   :  { %v175_v9 = vsel %vm173_vm6, %v172_v7, 0.0 }
 0x2c3   :  { %v176_v10 = vadd.f32 %v175_v9, %v174_v8 }
 0x2c5   :  { %v177_v11 = vrot.slane %v176_v10, 4 }
 0x2c7   :  { %v178_v12 = vadd.f32 %v177_v11, %v176_v10 }
 0x2c9   :  { %v179_v13 = vrot.slane %v178_v12, 2 }
 0x2cb   :  { %v180_v14 = vadd.f32 %v179_v13, %v178_v12 }
 0x2cd   :  { %v181_v15 = vrot.slane %v180_v14, 1 }
 0x2cf   :  { %v182_v17 = vadd.f32 %v181_v15, %v180_v14 }
 0x2d1   :  { %v194_v18 = vmul.f32 %v259_v16, %v182_v17 }
 0x2d3   :  { %196 = vst.msk [vmem:[#allocation2] sm:$0x1] %vm195_vm7, %v194_v18 }
 0x2d4   :  { %271 = shalt.err (!%p268_p4)
}
 0x2d5   :  { %s272_s9 = scalar_lea.hbm %s370_s4, 16 }
 0x2d6   :  { %p273_p5 = scmp.ne.s32.totalorder %s370_s4, %s272_s9  ;;  %p276_p6 = scmp.lt.u32.totalorder %s272_s9, %s370_s4 }
 0x2d8   :  { %p278_p7 = pnand %p276_p6, %p273_p5 }
 0x2da   :  { %281 = shalt.err (!%p278_p7)
}
 0x2db   :  { %206 = dma.vmem_to_hbm [thread:$0]  %s204_s3, 16, %s370_s4, [#allocation3]  }
 0x2dc   :  { %282 = dma.done.wait [#allocation3], 16  }
 0x2dd   :  { %283 = vsyncadd [#allocation3], 4294967280 }
 0x2de   :  { %210 = vsyncpa [#allocation3], 1 }

// kernel: llama_adapter_forward.5
= control target key start
LH: loop header
LB: loop body
LE: loop exit
PB: predicated region body
PF: predicated region fallthrough
CT: control target
= control target key end

     0   :  { %vm49_vm0 = vcmask 523264   ;;  %v2317_v7 = vmov 0.0   ;;  %vm2318_vm1 = vmmov 0   ;;  %vm173_vm2 = vcmask 1045504   ;;  %s2323_s29 = smov 48   ;;  %s2325_s30 = smov 112   ;;  %s2811_s0 = inlined_call_operand.vmem [shape: f32[16,64], index: 0, kind: input, shape index: {}]   ;;  %s2812_s11 = inlined_call_operand.vmem [shape: bf16[2,64,12], index: 11, kind: input, shape index: {}]   ;;  %s2813_s12 = inlined_call_operand.vmem [shape: bf16[2,12,192], index: 12, kind: input, shape index: {}]   ;;  %s2814_s1 = inlined_call_operand.vmem [shape: f32[1,64], index: 1, kind: input, shape index: {}]   ;;  %s2815_s3 = inlined_call_operand.vmem [shape: bf16[64,192], index: 3, kind: input, shape index: {}]   ;;  %s2816_s9 = inlined_call_operand.vmem [shape: bf16[64,64], index: 9, kind: input, shape index: {}]   ;;  %s2817_s7 = inlined_call_operand.vmem [shape: f32[16,64], index: 7, kind: input, shape index: {}]   ;;  %s2818_s8 = inlined_call_operand.vmem [shape: f32[16,64], index: 8, kind: input, shape index: {}]   ;;  %s2819_s10 = inlined_call_operand.vmem [shape: f32[8,8], index: 10, kind: input, shape index: {}]   ;;  %s2820_s4 = inlined_call_operand.vmem [shape: bf16[64,64], index: 4, kind: input, shape index: {}]   ;;  %s2821_s5 = inlined_call_operand.vmem [shape: bf16[64,256], index: 5, kind: input, shape index: {}]   ;;  %s2822_s2 = inlined_call_operand.vmem [shape: f32[1,64], index: 2, kind: input, shape index: {}]   ;;  %s2823_s6 = inlined_call_operand.vmem [shape: bf16[128,64], index: 6, kind: input, shape index: {}]   ;;  %s2824_s13 = inlined_call_operand.vmem [shape: f32[16,64], index: 13, kind: output, shape index: {}]  }
   0x1   :  { %v45_v0 = vld [vmem:[%s2811_s0] sm:$0xff]  ;;  %v46_v1 = vld [vmem:[%s2811_s0 + $0x8] sm:$0xff]  ;;  %2012 = vmatprep.subr.bf16.mxu0 %v2317_v7  ;;  %2020 = vmatprep.mubr.msk.bf16.mxu0 %vm2318_vm1, %v2317_v7  ;;  %v2215_v9 = vld [vmem:[%s2812_s11 + $0x10] sm:$0xff]   ;;  %v2319_v34 = vmov 0   ;;  %vm169_vm3 = vcmask 97280   ;;  %s2326_s14 = smov 16  }
   0x2   :  { %v47_v2 = vmul.f32 %v45_v0, %v45_v0  ;;  %v48_v3 = vmul.f32 %v46_v1, %v46_v1  ;;  %v2213_v6 = vld [vmem:[%s2812_s11] sm:$0xff]   ;;  %v2214_v8 = vld [vmem:[%s2812_s11 + $0x8] sm:$0xff]   ;;  %v2216_v10 = vld [vmem:[%s2812_s11 + $0x18] sm:$0xff]   ;;  %212 = vmatprep.mubr.bf16.mxu1 %v2319_v34  ;;  %vm607_vm4 = vcmask 130048   ;;  %vm672_vm5 = vcmask 1043456  }
   0x3   :  { %2013 = vmatpush3.bf16.msra.mxu0 %v2213_v6  ;;  %v2221_v11 = vld [vmem:[%s2813_s12 + $0x4] ss:$8 sps:$4 sm:$0x3f]   ;;  %v2223_v12 = vld [vmem:[%s2813_s12] ss:$8 sps:$4 sm:$0x3f]  }
   0x4   :  { %v50_v4 = vsel %vm49_vm0, %v47_v2, 0.0  ;;  %v53_v5 = vsel %vm49_vm0, %v48_v3, 0.0  ;;  %2014 = vmatprep.subr.bf16.mxu0 %v2317_v7  ;;  %1871 = vmatprep.subr.msk.bf16.mxu1 %vm173_vm2, %v2221_v11  ;;  %v175_v13 = vsel %vm173_vm2, %v2223_v12, 0  ;;  %v1863_v23 = vld [vmem:[%s2814_s1] ss:$0 sm:$0xff]  ;;  %v2218_v29 = vld [vmem:[%s2812_s11 + $0x28] sm:$0xff]  }
   0x5   :  { %51 = vadd.xlane.f32.xlu0 %v50_v4  ;;  %181 = vmatpush1.bf16.msra.mxu1 %v175_v13  ;;  %v2217_v27 = vld [vmem:[%s2812_s11 + $0x20] sm:$0xff]   ;;  %v2219_v30 = vld [vmem:[%s2812_s11 + $0x30] sm:$0xff]   ;;  %v2220_v31 = vld [vmem:[%s2812_s11 + $0x38] sm:$0xff]   ;;  %s2324_s1 = smov 32   ;;  %vm656_vm6 = vcmask 64512   ;;  %vm1067_vm7 = vcmask 261120  }
   0x6   :  { %v2226_v33 = vld [vmem:[%s2815_s3 + $0x4] ss:$8 sps:$4 sm:$0xff]   ;;  %v2233_v35 = vld [vmem:[%s2813_s12 + $0x14] ss:$8 sps:$4 sm:$0x3f]   ;;  %vm1069_vm8 = vcmask 392192  }
   0x7   :  { %2015 = vmatpush3.bf16.msra.mxu0 %v2214_v8  ;;  %401 = vmatprep.subr.bf16.mxu1 %v2226_v33  ;;  %v2235_v36 = vld [vmem:[%s2813_s12 + $0x10] ss:$8 sps:$4 sm:$0x3f]   ;;  %v2224_v39 = vld [vmem:[%s2815_s3] ss:$8 sps:$4 sm:$0xff]  }
   0x8   :  { %2016 = vmatprep.subr.bf16.mxu0 %v2317_v7  ;;  %v315_v37 = vsel %vm173_vm2, %v2235_v36, 0  ;;  %v2229_v42 = vld [vmem:[%s2815_s3 + $0x14] ss:$8 sps:$4 sm:$0xff]   ;;  %v2227_v45 = vld [vmem:[%s2815_s3 + $0x10] ss:$8 sps:$4 sm:$0xff]   ;;  %v2239_v55 = vld [vmem:[%s2816_s9] sm:$0xff]  }
   0x9   :  { %54 = vadd.xlane.f32.xlu0 %v53_v5  ;;  %v2232_v46 = vld [vmem:[%s2815_s3 + $0x24] ss:$8 sps:$4 sm:$0xff]   ;;  %v2230_v47 = vld [vmem:[%s2815_s3 + $0x20] ss:$8 sps:$4 sm:$0xff]   ;;  %v2238_v48 = vld [vmem:[%s2815_s3 + $0x34] ss:$8 sps:$4 sm:$0xff]  }
   0xa   :  { %v2236_v49 = vld [vmem:[%s2815_s3 + $0x30] ss:$8 sps:$4 sm:$0xff]   ;;  %v2240_v56 = vld [vmem:[%s2816_s9 + $0x8] sm:$0xff]   ;;  %v444_v13 = vld [vmem:[%s2817_s7] sm:$0xff] }
   0xb   :  { %2017 = vmatpush3.bf16.msra.mxu0 %v2215_v9  ;;  %v2241_v57 = vld [vmem:[%s2816_s9 + $0x10] sm:$0xff]   ;;  %v2242_v58 = vld [vmem:[%s2816_s9 + $0x18] sm:$0xff]   ;;  %s2320_s9 = smov 64  }
   0xc   :  { %2018 = vmatprep.subr.bf16.mxu0 %v2317_v7 }
   0xf   :  { %2019 = vmatpush3.bf16.msra.mxu0 %v2216_v10 }
  0x10   :  { %2024 = vmatprep.subr.bf16.mxu0 %v2317_v7 }
  0x92   :  { %v52_v14 = vpop.xlane.xlu0 %51 }
  0x93   :  { %v57_v15 = vmul.f32 0.015625, %v52_v14  ;;  %v445_v14 = vld [vmem:[%s2817_s7 + $0x8] sm:$0xff]  ;;  %s2321_s7 = smov 96  }
  0x95   :  { %v59_v16 = vadd.f32 1e-05, %v57_v15 }
  0x96   :  { %v55_v17 = vpop.xlane.xlu0 %54 }
  0x97   :  { %2267 = vrsqrt.f32 %v59_v16  ;;  %v58_v18 = vmul.f32 0.015625, %v55_v17  ;;  %v446_v16 = vld [vmem:[%s2818_s8] sm:$0xff] }
  0x99   :  { %v60_v19 = vadd.f32 1e-05, %v58_v18  ;;  %v447_v18 = vld [vmem:[%s2818_s8 + $0x8] sm:$0xff]  ;;  %s2322_s8 = smov 80  }
  0x9b   :  { %2269 = vrsqrt.f32 %v60_v19 }
  0xa1   :  { %v2268_v20 = vpop.eup %2267 }
  0xa2   :  { %v63_v21 = vmul.f32 %v2268_v20, %v45_v0 }
  0xa4   :  { %v72_v25 = vmul.f32 %v1863_v23, %v63_v21 }
  0xa5   :  { %v2270_v22 = vpop.eup %2269 }
  0xa6   :  { %v64_v24 = vmul.f32 %v2270_v22, %v46_v1 }
  0xa8   :  { %v73_v26 = vmul.f32 %v1863_v23, %v64_v24 }
  0xaa   :  { %v74_v28 = vpack.c.bf16 %v73_v26, %v72_v25 }
  0xac   :  { %2021 = vmatmul.mubr.msk.bf16.vlgmr.msra.gmra.mrb[0].mxu0 %vm49_vm0, %v74_v28  ;;  %v231_v32 = vrot.slane %v74_v28, 4 }
  0xad   :  { %2025 = vmatpush3.bf16.msra.mxu0 %v2217_v27  ;;  %2032 = vmatprep.mubr.msk.bf16.mxu0 %vm2318_vm1, %v2317_v7 }
  0xae   :  { %2026 = vmatprep.subr.bf16.mxu0 %v2317_v7 }
  0xb1   :  { %2027 = vmatpush3.bf16.msra.mxu0 %v2218_v29 }
  0xb2   :  { %2028 = vmatprep.subr.bf16.mxu0 %v2317_v7 }
  0xb5   :  { %2029 = vmatpush3.bf16.msra.mxu0 %v2219_v30 }
  0xb6   :  { %2030 = vmatprep.subr.bf16.mxu0 %v2317_v7 }
  0xb9   :  { %2031 = vmatpush3.bf16.msra.mxu0 %v2220_v31 }
  0xba   :  { %1890 = vmatprep.subr.msk.bf16.mxu0 %vm173_vm2, %v2233_v35 }
  0xbc   :  { %2033 = vmatmul.mubr.msk.bf16.vlgmr.msra.gmra.mrb[4].mxu0 %vm49_vm0, %v231_v32 }
  0xbd   :  { %352 = vmatprep.mubr.bf16.mxu0 %v2319_v34  ;;  %321 = vmatpush1.bf16.msra.mxu0 %v315_v37 }
  0xbe   :  { %2036 = vmatprep.subr.bf16.mxu0 %v2317_v7 }
 0x17f   :  { %v152_v38 = vpop.f32.mrb[0].mxu0 }
 0x180   :  { %v158_v40 = vpack.c.bf16 %v152_v38, %v152_v38  ;;  %v2022_v41 = vpop.f32.mrb[1].mxu0 }
 0x181   :  { %v155_v43 = vpop.f32.mrb[2].mxu0 }
 0x182   :  { %v2023_v44 = vpop.f32.mrb[3].mxu0  ;;  %1872 = vmatmul.mubr.msk.bf16.vlgmr.msra.gmra.mrb[0].mxu1 %vm169_vm3, %v158_v40 }
 0x183   :  { %402 = vmatpush1.bf16.msra.mxu1 %v2224_v39  ;;  %433 = vmatprep.mubr.bf16.mxu1 %v2319_v34 }
 0x184   :  { %403 = vmatprep.subr.bf16.mxu1 %v2229_v42 }
 0x187   :  { %404 = vmatpush1.bf16.msra.mxu1 %v2227_v45 }
 0x188   :  { %405 = vmatprep.subr.bf16.mxu1 %v2232_v46 }
 0x18b   :  { %406 = vmatpush1.bf16.msra.mxu1 %v2230_v47 }
 0x18c   :  { %407 = vmatprep.subr.bf16.mxu1 %v2238_v48 }
 0x18f   :  { %v293_v50 = vpop.f32.mrb[4].mxu0  ;;  %408 = vmatpush1.bf16.msra.mxu1 %v2236_v49 }
 0x190   :  { %v299_v51 = vpack.c.bf16 %v293_v50, %v293_v50  ;;  %v2034_v52 = vpop.f32.mrb[5].mxu0  ;;  %2048 = vmatprep.subr.bf16.mxu1 %v2317_v7 }
 0x191   :  { %v296_v53 = vpop.f32.mrb[6].mxu0 }
 0x192   :  { %v2035_v54 = vpop.f32.mrb[7].mxu0  ;;  %1891 = vmatmul.mubr.msk.bf16.vlgmr.msra.gmra.mrb[8].mxu0 %vm169_vm3, %v299_v51  ;;  %1900 = vmatmul.mubr.msk.bf16.vlgmr.msra.gmra.mrb[4].mxu1 %vm49_vm0, %v74_v28 }
 0x193   :  { %2044 = vmatprep.mubr.msk.bf16.mxu0 %vm2318_vm1, %v2317_v7  ;;  %2056 = vmatprep.mubr.msk.bf16.mxu1 %vm2318_vm1, %v2317_v7 }
 0x194   :  { %2037 = vmatpush3.bf16.msra.mxu0 %v2239_v55  ;;  %2049 = vmatpush3.bf16.msra.mxu1 %v2239_v55 }
 0x195   :  { %2038 = vmatprep.subr.bf16.mxu0 %v2317_v7  ;;  %2050 = vmatprep.subr.bf16.mxu1 %v2317_v7 }
 0x198   :  { %2039 = vmatpush3.bf16.msra.mxu0 %v2240_v56  ;;  %2051 = vmatpush3.bf16.msra.mxu1 %v2240_v56 }
 0x199   :  { %2040 = vmatprep.subr.bf16.mxu0 %v2317_v7  ;;  %2052 = vmatprep.subr.bf16.mxu1 %v2317_v7 }
 0x19c   :  { %2041 = vmatpush3.bf16.msra.mxu0 %v2241_v57  ;;  %2053 = vmatpush3.bf16.msra.mxu1 %v2241_v57 }
 0x19d   :  { %2042 = vmatprep.subr.bf16.mxu0 %v2317_v7  ;;  %2054 = vmatprep.subr.bf16.mxu1 %v2317_v7 }
 0x1a0   :  { %2043 = vmatpush3.bf16.msra.mxu0 %v2242_v58  ;;  %2055 = vmatpush3.bf16.msra.mxu1 %v2242_v58 }
 0x1a1   :  { %2060 = vmatprep.subr.bf16.mxu0 %v2317_v7  ;;  %2072 = vmatprep.subr.bf16.mxu1 %v2317_v7 }
 0x255   :  { %v214_v59 = vpop.f32.mrb[0].mxu1 }
 0x256   :  { %v216_v60 = vpop.f32.mrb[1].mxu1 }
 0x257   :  { %v218_v61 = vpop.f32.mrb[2].mxu1 }
 0x258   :  { %v219_v62 = vpop.f32.mrb[3].mxu1 }
 0x265   :  { %v354_v63 = vpop.f32.mrb[8].mxu0  ;;  %v435_v0 = vpop.f32.mrb[4].mxu1 }
 0x266   :  { %v436_v1 = vadd.f32 %v435_v0, %v214_v59  ;;  %v356_v2 = vpop.f32.mrb[9].mxu0  ;;  %v437_v3 = vpop.f32.mrb[5].mxu1 }
 0x267   :  { %v2518_v4 = vadd.f32 %v437_v3, %v216_v60  ;;  %v358_v5 = vpop.f32.mrb[10].mxu0  ;;  %v439_v6 = vpop.f32.mrb[6].mxu1 }
 0x268   :  { %v440_v8 = vadd.f32 %v439_v6, %v354_v63  ;;  %v359_v9 = vpop.f32.mrb[11].mxu0  ;;  %v441_v10 = vpop.f32.mrb[7].mxu1  ;;  %v525_v19 = vmul.f32 %v444_v13, %v436_v1 }
 0x269   :  { %v2520_v11 = vadd.f32 %v441_v10, %v356_v2  ;;  %v2563_v50 = vpack.c.bf16 %v2518_v4, %v2518_v4  ;;  %v600_v9 = vld [vmem:[%s2819_s10] sm:$0xff] }
 0x26a   :  { %v456_v12 = vpack.c.bf16 %v440_v8, %v436_v1  ;;  %v526_v23 = vmul.f32 %v445_v14, %v440_v8 }
 0x26b   :  { %v674_v53 = vsel %vm672_vm5, %v2563_v50, 0 }
 0x26c   :  { %532 = vrot.lane.b32.xlu1 %v456_v12, %s2320_s9  ;;  %2045 = vmatmul.mubr.msk.bf16.vlgmr.msra.gmra.mrb[12].mxu0 %vm49_vm0, %v456_v12 }
 0x26d   :  { %2062 = vmatprep.mubr.msk.bf16.mxu0 %vm2318_vm1, %v2317_v7 }
 0x270   :  { %580 = vrot.lane.b32.xlu1 %v444_v13, %s2320_s9 }
 0x274   :  { %582 = vrot.lane.b32.xlu1 %v445_v14, %s2320_s9 }
 0x2de   :  { %v533_v15 = vpop.permute.xlu1 %532 }
 0x2df   :  { %2057 = vmatmul.mubr.msk.bf16.vlgmr.msra.gmra.mrb[8].mxu1 %vm49_vm0, %v533_v15 }
 0x2e0   :  { %2074 = vmatprep.mubr.msk.bf16.mxu1 %vm2318_vm1, %v2317_v7 }
 0x2e2   :  { %v581_v36 = vpop.permute.xlu1 %580 }
 0x2e3   :  { %v586_v38 = vmul.f32 %v581_v36, %v436_v1 }
 0x2e6   :  { %v583_v37 = vpop.permute.xlu1 %582 }
 0x2e7   :  { %v587_v40 = vmul.f32 %v583_v37, %v440_v8 }
 0x33f   :  { %v518_v17 = vpop.f32.mrb[12].mxu0 }
 0x340   :  { %v527_v20 = vmul.f32 %v518_v17, %v446_v16  ;;  %v2046_v21 = vpop.f32.mrb[13].mxu0 }
 0x341   :  { %v521_v22 = vpop.f32.mrb[14].mxu0 }
 0x342   :  { %v529_v24 = vadd.f32 %v527_v20, %v525_v19  ;;  %v528_v25 = vmul.f32 %v521_v22, %v447_v18  ;;  %v2047_v26 = vpop.f32.mrb[15].mxu0 }
 0x344   :  { %v530_v27 = vadd.f32 %v528_v25, %v526_v23  ;;  %v601_v35 = vpack.c.bf16 %v529_v24, %v529_v24 }
 0x346   :  { %v1071_v46 = vpack.c.bf16 %v530_v27, %v530_v27 }
 0x3b2   :  { %v571_v28 = vpop.f32.mrb[8].mxu1 }
 0x3b3   :  { %v588_v29 = vmul.f32 %v571_v28, %v446_v16  ;;  %v2058_v30 = vpop.f32.mrb[9].mxu1 }
 0x3b4   :  { %v574_v31 = vpop.f32.mrb[10].mxu1 }
 0x3b5   :  { %v589_v32 = vmul.f32 %v574_v31, %v447_v18  ;;  %592 = vrot.lane.b32.xlu0 %v588_v29, %s2320_s9  ;;  %v2059_v33 = vpop.f32.mrb[11].mxu1 }
 0x3b7   :  { %594 = vrot.lane.b32.xlu1 %v589_v32, %s2320_s9 }
 0x3b9   :  { %830 = vrot.lane.b32.xlu0 %v601_v35, %s2321_s7 }
 0x3bd   :  { %942 = vrot.lane.b32.xlu0 %v601_v35, %s2322_s8 }
 0x427   :  { %v593_v39 = vpop.permute.xlu0 %592 }
 0x428   :  { %v598_v41 = vadd.f32 %v593_v39, %v586_v38 }
 0x429   :  { %v595_v42 = vpop.permute.xlu1 %594 }
 0x42a   :  { %v602_v43 = vpack.c.bf16 %v598_v41, %v598_v41  ;;  %v599_v44 = vadd.f32 %v595_v42, %v587_v40 }
 0x42b   :  { %v831_v57 = vpop.permute.xlu0 %830 }
 0x42c   :  { %v1072_v45 = vpack.c.bf16 %v599_v44, %v599_v44  ;;  %605 = vrot.lane.b32.xlu1 %v602_v43, %s2320_s9 }
 0x42e   :  { %1186 = vrot.lane.b32.xlu0 %v1072_v45, %s2323_s29 }
 0x42f   :  { %v943_v60 = vpop.permute.xlu0 %942 }
 0x430   :  { %719 = vrot.lane.b32.xlu1 %v602_v43, %s2323_s29 }
 0x432   :  { %1299 = vrot.lane.b32.xlu0 %v1072_v45, %s2324_s1 }
 0x434   :  { %717 = vrot.lane.b32.xlu1 %v601_v35, %s2325_s30 }
 0x436   :  { %1411 = vrot.lane.b32.xlu0 %v1072_v45, %s2326_s14 }
 0x438   :  { %832 = vrot.lane.b32.xlu1 %v602_v43, %s2324_s1 }
 0x43c   :  { %944 = vrot.lane.b32.xlu1 %v602_v43, %s2326_s14 }
 0x440   :  { %1075 = vrot.lane.b32.xlu1 %v1072_v45, %s2320_s9 }
 0x444   :  { %1184 = vrot.lane.b32.xlu1 %v1071_v46, %s2325_s30 }
 0x448   :  { %1297 = vrot.lane.b32.xlu1 %v1071_v46, %s2321_s7 }
 0x44c   :  { %1409 = vrot.lane.b32.xlu1 %v1071_v46, %s2322_s8 }
 0x49e   :  { %v606_v47 = vpop.permute.xlu1 %605 }
 0x49f   :  { %v612_v48 = vsel %vm607_vm4, %v606_v47, 0 }
 0x4a0   :  { %2061 = vmatpush3.bf16.xpose.msra.mxu0 %v612_v48  ;;  %v1187_v62 = vpop.permute.xlu0 %1186 }
 0x4a1   :  { %2066 = vmatprep.subr.bf16.mxu0 %v2317_v7  ;;  %v1192_v63 = vsel %vm607_vm4, %v1187_v62, 0 }
 0x4a2   :  { %v720_v49 = vpop.permute.xlu1 %719 }
 0x4a3   :  { %v725_v51 = vsel %vm607_vm4, %v720_v49, 0 }
 0x4a4   :  { %2073 = vmatpush3.bf16.xpose.msra.mxu1 %v725_v51  ;;  %v1300_v0 = vpop.permute.xlu0 %1299 }
 0x4a5   :  { %2084 = vmatprep.subr.bf16.mxu1 %v2317_v7  ;;  %v1305_v2 = vsel %vm607_vm4, %v1300_v0, 0 }
 0x4a6   :  { %v718_v52 = vpop.permute.xlu1 %717 }
 0x4a7   :  { %2063 = vmatmul.mubr.msk.bf16.vlgmr.msra.gmra.mrb[16].mxu0 %vm607_vm4, %v601_v35 }
 0x4a8   :  { %2067 = vmatpush3.bf16.msra.mxu0 %v674_v53  ;;  %2068 = vmatprep.mubr.msk.bf16.mxu0 %vm2318_vm1, %v2317_v7  ;;  %v1412_v3 = vpop.permute.xlu0 %1411 }
 0x4a9   :  { %2078 = vmatprep.subr.bf16.mxu0 %v2317_v7  ;;  %v1417_v5 = vsel %vm607_vm4, %v1412_v3, 0 }
 0x4aa   :  { %v833_v54 = vpop.permute.xlu1 %832 }
 0x4ab   :  { %v838_v55 = vsel %vm607_vm4, %v833_v54, 0  ;;  %2075 = vmatmul.mubr.msk.bf16.vlgmr.msra.gmra.mrb[12].mxu1 %vm607_vm4, %v718_v52 }
 0x4ac   :  { %2085 = vmatpush3.bf16.xpose.msra.mxu1 %v838_v55  ;;  %2086 = vmatprep.mubr.msk.bf16.mxu1 %vm2318_vm1, %v2317_v7 }
 0x4ad   :  { %2096 = vmatprep.subr.bf16.mxu1 %v2317_v7 }
 0x4ae   :  { %v945_v56 = vpop.permute.xlu1 %944 }
 0x4af   :  { %v950_v58 = vsel %vm607_vm4, %v945_v56, 0 }
 0x4b2   :  { %v1076_v59 = vpop.permute.xlu1 %1075 }
 0x4b3   :  { %2087 = vmatmul.mubr.msk.bf16.vlgmr.msra.gmra.mrb[16].mxu1 %vm607_vm4, %v831_v57  ;;  %v1081_v61 = vsel %vm607_vm4, %v1076_v59, 0 }
 0x4b4   :  { %2097 = vmatpush3.bf16.xpose.msra.mxu1 %v950_v58  ;;  %2098 = vmatprep.mubr.msk.bf16.mxu1 %vm2318_vm1, %v2317_v7 }
 0x4b5   :  { %2108 = vmatprep.subr.bf16.mxu1 %v2317_v7 }
 0x4b6   :  { %v1185_v1 = vpop.permute.xlu1 %1184 }
 0x4ba   :  { %v1298_v4 = vpop.permute.xlu1 %1297 }
 0x4bb   :  { %2099 = vmatmul.mubr.msk.bf16.vlgmr.msra.gmra.mrb[20].mxu1 %vm607_vm4, %v943_v60 }
 0x4bc   :  { %2109 = vmatpush3.bf16.xpose.msra.mxu1 %v1081_v61  ;;  %2110 = vmatprep.mubr.msk.bf16.mxu1 %vm2318_vm1, %v2317_v7 }
 0x4bd   :  { %2120 = vmatprep.subr.bf16.mxu1 %v2317_v7 }
 0x4be   :  { %v1410_v6 = vpop.permute.xlu1 %1409 }
 0x4c3   :  { %2111 = vmatmul.mubr.msk.bf16.vlgmr.msra.gmra.mrb[24].mxu1 %vm607_vm4, %v1071_v46 }
 0x4c4   :  { %2121 = vmatpush3.bf16.xpose.msra.mxu1 %v1192_v63  ;;  %2122 = vmatprep.mubr.msk.bf16.mxu1 %vm2318_vm1, %v2317_v7 }
 0x4c5   :  { %2132 = vmatprep.subr.bf16.mxu1 %v2317_v7 }
 0x4cb   :  { %2123 = vmatmul.mubr.msk.bf16.vlgmr.msra.gmra.mrb[28].mxu1 %vm607_vm4, %v1185_v1 }
 0x4cc   :  { %2133 = vmatpush3.bf16.xpose.msra.mxu1 %v1305_v2  ;;  %2134 = vmatprep.mubr.msk.bf16.mxu1 %vm2318_vm1, %v2317_v7 }
 0x4cd   :  { %2144 = vmatprep.subr.bf16.mxu1 %v2317_v7 }
 0x4d3   :  { %2135 = vmatmul.mubr.msk.bf16.vlgmr.msra.gmra.mrb[32].mxu1 %vm607_vm4, %v1298_v4 }
 0x4d4   :  { %2145 = vmatpush3.bf16.xpose.msra.mxu1 %v1417_v5  ;;  %2146 = vmatprep.mubr.msk.bf16.mxu1 %vm2318_vm1, %v2317_v7 }
 0x4d5   :  { %2156 = vmatprep.subr.bf16.mxu1 %v2317_v7 }
 0x4db   :  { %2147 = vmatmul.mubr.msk.bf16.vlgmr.msra.gmra.mrb[36].mxu1 %vm607_vm4, %v1410_v6 }
 0x4dc   :  { %2164 = vmatprep.mubr.msk.bf16.mxu1 %vm2318_vm1, %v2317_v7 }
 0x57a   :  { %v648_v8 = vpop.f32.mrb[16].mxu0 }
 0x57b   :  { %v654_v10 = vmul.f32 0.25, %v648_v8  ;;  %v2064_v12 = vpop.f32.mrb[17].mxu0 }
 0x57c   :  { %v651_v13 = vpop.f32.mrb[18].mxu0 }
 0x57d   :  { %v2065_v14 = vpop.f32.mrb[19].mxu0  ;;  %v655_v15 = vadd.f32 %v654_v10, %v600_v9 }
 0x57e   :  { %v761_v16 = vpop.f32.mrb[12].mxu1 }
 0x57f   :  { %v767_v17 = vmul.f32 0.25, %v761_v16  ;;  %v2076_v18 = vpop.f32.mrb[13].mxu1  ;;  %v657_v19 = vsel %vm656_vm6, %v655_v15, -inf }
 0x580   :  { %v764_v20 = vpop.f32.mrb[14].mxu1  ;;  %658 = vmax.xlane.f32.xlu0 %v657_v19 }
 0x581   :  { %v2077_v21 = vpop.f32.mrb[15].mxu1  ;;  %v768_v22 = vadd.f32 %v767_v17, %v600_v9 }
 0x583   :  { %v769_v23 = vsel %vm656_vm6, %v768_v22, -inf }
 0x584   :  { %770 = vmax.xlane.f32.xlu1 %v769_v23 }
 0x586   :  { %v874_v24 = vpop.f32.mrb[16].mxu1 }
 0x587   :  { %v880_v25 = vmul.f32 0.25, %v874_v24  ;;  %v2088_v26 = vpop.f32.mrb[17].mxu1 }
 0x588   :  { %v877_v27 = vpop.f32.mrb[18].mxu1 }
 0x589   :  { %v2089_v28 = vpop.f32.mrb[19].mxu1  ;;  %v881_v29 = vadd.f32 %v880_v25, %v600_v9 }
 0x58b   :  { %v882_v30 = vsel %vm656_vm6, %v881_v29, -inf }
 0x58c   :  { %883 = vmax.xlane.f32.xlu0 %v882_v30 }
 0x58e   :  { %v986_v31 = vpop.f32.mrb[20].mxu1 }
 0x58f   :  { %v992_v32 = vmul.f32 0.25, %v986_v31  ;;  %v2100_v33 = vpop.f32.mrb[21].mxu1 }
 0x590   :  { %v989_v35 = vpop.f32.mrb[22].mxu1 }
 0x591   :  { %v2101_v36 = vpop.f32.mrb[23].mxu1  ;;  %v993_v37 = vadd.f32 %v992_v32, %v600_v9 }
 0x593   :  { %v994_v38 = vsel %vm656_vm6, %v993_v37, -inf }
 0x594   :  { %995 = vmax.xlane.f32.xlu0 %v994_v38 }
 0x596   :  { %v1117_v39 = vpop.f32.mrb[24].mxu1 }
 0x597   :  { %v1123_v40 = vmul.f32 0.25, %v1117_v39  ;;  %v2112_v41 = vpop.f32.mrb[25].mxu1 }
 0x598   :  { %v1120_v42 = vpop.f32.mrb[26].mxu1 }
 0x599   :  { %v2113_v43 = vpop.f32.mrb[27].mxu1  ;;  %v2613_v44 = vadd.f32 %v1123_v40, %v600_v9 }
 0x59b   :  { %v1125_v45 = vsel %vm656_vm6, %v2613_v44, -inf }
 0x59c   :  { %1126 = vmax.xlane.f32.xlu1 %v1125_v45 }
 0x59e   :  { %v1228_v46 = vpop.f32.mrb[28].mxu1 }
 0x59f   :  { %v1234_v47 = vmul.f32 0.25, %v1228_v46  ;;  %v2124_v48 = vpop.f32.mrb[29].mxu1  ;;  %v1073_v46 = vpack.c.bf16 %v2520_v11, %v2520_v11 }
 0x5a0   :  { %v1231_v49 = vpop.f32.mrb[30].mxu1 }
 0x5a1   :  { %v2125_v51 = vpop.f32.mrb[31].mxu1  ;;  %v1235_v52 = vadd.f32 %v1234_v47, %v600_v9 }
 0x5a3   :  { %v1236_v53 = vsel %vm656_vm6, %v1235_v52, -inf }
 0x5a4   :  { %1237 = vmax.xlane.f32.xlu0 %v1236_v53 }
 0x5a6   :  { %v1341_v54 = vpop.f32.mrb[32].mxu1 }
 0x5a7   :  { %v1347_v55 = vmul.f32 0.25, %v1341_v54  ;;  %v2136_v56 = vpop.f32.mrb[33].mxu1 }
 0x5a8   :  { %v1344_v57 = vpop.f32.mrb[34].mxu1 }
 0x5a9   :  { %v2137_v58 = vpop.f32.mrb[35].mxu1  ;;  %v1348_v59 = vadd.f32 %v1347_v55, %v600_v9 }
 0x5ab   :  { %v1349_v60 = vsel %vm656_vm6, %v1348_v59, -inf }
 0x5ac   :  { %1350 = vmax.xlane.f32.xlu1 %v1349_v60 }
 0x5ae   :  { %v1453_v61 = vpop.f32.mrb[36].mxu1 }
 0x5af   :  { %v1459_v62 = vmul.f32 0.25, %v1453_v61  ;;  %v2148_v63 = vpop.f32.mrb[37].mxu1 }
 0x5b0   :  { %v1456_v0 = vpop.f32.mrb[38].mxu1 }
 0x5b1   :  { %v2149_v1 = vpop.f32.mrb[39].mxu1  ;;  %v1460_v2 = vadd.f32 %v1459_v62, %v600_v9 }
 0x5b3   :  { %v1461_v3 = vsel %vm656_vm6, %v1460_v2, -inf }
 0x5b4   :  { %1462 = vmax.xlane.f32.xlu0 %v1461_v3 }
 0x60d   :  { %v659_v4 = vpop.xlane.xlu0 %658 }
 0x60e   :  { %v660_v5 = vsub.f32 %v655_v15, %v659_v4 }
 0x610   :  { %v661_v6 = vmul.f32 1.442695, %v660_v5  ;;  %v1141_v5 = vsel %vm672_vm5, %v1073_v46, 0 }
 0x611   :  { %v771_v8 = vpop.xlane.xlu1 %770 }
 0x612   :  { %2271 = vpow2.f32 %v661_v6  ;;  %v772_v10 = vsub.f32 %v768_v22, %v771_v8 }
 0x614   :  { %v773_v12 = vmul.f32 1.442695, %v772_v10 }
 0x616   :  { %2273 = vpow2.f32 %v773_v12 }
 0x619   :  { %v884_v13 = vpop.xlane.xlu0 %883 }
 0x61a   :  { %v885_v14 = vsub.f32 %v881_v29, %v884_v13 }
 0x61c   :  { %v2272_v16 = vpop.eup %2271  ;;  %v886_v17 = vmul.f32 1.442695, %v885_v14 }
 0x61d   :  { %v663_v18 = vsel %vm656_vm6, %v2272_v16, 0.0 }
 0x61e   :  { %2275 = vpow2.f32 %v886_v17  ;;  %664 = vadd.xlane.f32.xlu1 %v663_v18 }
 0x620   :  { %v2274_v9 = vpop.eup %2273 }
 0x621   :  { %v996_v19 = vpop.xlane.xlu0 %995  ;;  %v775_v20 = vsel %vm656_vm6, %v2274_v9, 0.0 }
 0x622   :  { %v997_v21 = vsub.f32 %v993_v37, %v996_v19  ;;  %776 = vadd.xlane.f32.xlu0 %v775_v20 }
 0x624   :  { %v998_v15 = vmul.f32 1.442695, %v997_v21 }
 0x626   :  { %2277 = vpow2.f32 %v998_v15 }
 0x628   :  { %v2622_v23 = vpop.eup %2275 }
 0x629   :  { %v888_v22 = vsel %vm656_vm6, %v2622_v23, 0.0  ;;  %v1127_v26 = vpop.xlane.xlu1 %1126 }
 0x62a   :  { %889 = vadd.xlane.f32.xlu1 %v888_v22  ;;  %v1128_v27 = vsub.f32 %v2613_v44, %v1127_v26 }
 0x62c   :  { %v1129_v31 = vmul.f32 1.442695, %v1128_v27 }
 0x62e   :  { %2279 = vpow2.f32 %v1129_v31 }
 0x630   :  { %v2626_v24 = vpop.eup %2277 }
 0x631   :  { %v1000_v25 = vsel %vm656_vm6, %v2626_v24, 0.0  ;;  %v1238_v28 = vpop.xlane.xlu0 %1237 }
 0x632   :  { %1001 = vadd.xlane.f32.xlu0 %v1000_v25  ;;  %v1239_v30 = vsub.f32 %v1235_v52, %v1238_v28 }
 0x634   :  { %v1240_v35 = vmul.f32 1.442695, %v1239_v30 }
 0x636   :  { %2281 = vpow2.f32 %v1240_v35 }
 0x638   :  { %v2637_v39 = vpop.eup %2279 }
 0x639   :  { %v1351_v29 = vpop.xlane.xlu1 %1350  ;;  %v1131_v40 = vsel %vm656_vm6, %v2637_v39, 0.0 }
 0x63a   :  { %v1352_v32 = vsub.f32 %v1348_v59, %v1351_v29 }
 0x63b   :  { %894 = vrot.lane.b32.xlu1 %v2563_v50, %s2321_s7 }
 0x63c   :  { %v1353_v36 = vmul.f32 1.442695, %v1352_v32 }
 0x63e   :  { %2283 = vpow2.f32 %v1353_v36 }
 0x63f   :  { %1006 = vrot.lane.b32.xlu1 %v2563_v50, %s2322_s8 }
 0x641   :  { %v1463_v33 = vpop.xlane.xlu0 %1462 }
 0x642   :  { %v1464_v37 = vsub.f32 %v1460_v2, %v1463_v33 }
 0x644   :  { %v1465_v38 = vmul.f32 1.442695, %v1464_v37 }
 0x646   :  { %2285 = vpow2.f32 %v1465_v38 }
 0x648   :  { %782 = vrot.lane.b32.xlu0 %v2563_v50, %s2325_s30  ;;  %v2639_v50 = vpop.eup %2281 }
 0x649   :  { %v2643_v41 = vpop.eup %2283  ;;  %v1242_v43 = vsel %vm656_vm6, %v2639_v50, 0.0 }
 0x64a   :  { %v1355_v42 = vsel %vm656_vm6, %v2643_v41, 0.0 }
 0x650   :  { %v2649_v44 = vpop.eup %2285 }
 0x651   :  { %v1467_v45 = vsel %vm656_vm6, %v2649_v44, 0.0 }
 0x663   :  { %1132 = vadd.xlane.f32.xlu1 %v1131_v40 }
 0x667   :  { %1356 = vadd.xlane.f32.xlu0 %v1355_v42  ;;  %1243 = vadd.xlane.f32.xlu1 %v1242_v43 }
 0x66b   :  { %1468 = vadd.xlane.f32.xlu1 %v1467_v45 }
 0x67c   :  { %1361 = vrot.lane.b32.xlu1 %v1073_v46, %s2321_s7 }
 0x67d   :  { %1249 = vrot.lane.b32.xlu0 %v1073_v46, %s2325_s30 }
 0x681   :  { %1473 = vrot.lane.b32.xlu0 %v1073_v46, %s2322_s8 }
 0x6ab   :  { %v665_v47 = vpop.xlane.xlu1 %664 }
 0x6ac   :  { %2287 = vrcp.f32 %v665_v47 }
 0x6af   :  { %v777_v48 = vpop.xlane.xlu0 %776 }
 0x6b0   :  { %2289 = vrcp.f32 %v777_v48 }
 0x6b6   :  { %v2288_v49 = vpop.eup %2287 }
 0x6b7   :  { %v667_v51 = vmul.f32 %v2288_v49, %v2272_v16  ;;  %v890_v53 = vpop.xlane.xlu1 %889 }
 0x6b8   :  { %2291 = vrcp.f32 %v890_v53 }
 0x6b9   :  { %v668_v52 = vpack.c.bf16 %v667_v51, %v667_v51  ;;  %v2244_v51 = vld [vmem:[%s2820_s4 + $0x8] sm:$0xff]  }
 0x6ba   :  { %v2290_v11 = vpop.eup %2289 }
 0x6bb   :  { %2069 = vmatmul.mubr.msk.bf16.vlgmr.msra.gmra.mrb[20].mxu0 %vm656_vm6, %v668_v52  ;;  %v779_v55 = vmul.f32 %v2290_v11, %v2274_v9  ;;  %v895_v58 = vpop.permute.xlu1 %894 }
 0x6bc   :  { %2080 = vmatprep.mubr.msk.bf16.mxu0 %vm2318_vm1, %v2317_v7  ;;  %v900_v61 = vsel %vm672_vm5, %v895_v58, 0 }
 0x6bd   :  { %v780_v59 = vpack.c.bf16 %v779_v55, %v779_v55 }
 0x6bf   :  { %v1002_v54 = vpop.xlane.xlu0 %1001  ;;  %v1007_v63 = vpop.permute.xlu1 %1006 }
 0x6c0   :  { %2293 = vrcp.f32 %v1002_v54  ;;  %v1012_v2 = vsel %vm672_vm5, %v1007_v63, 0  ;;  %v2245_v54 = vld [vmem:[%s2820_s4 + $0x10] sm:$0xff]  }
 0x6c2   :  { %v2292_v60 = vpop.eup %2291 }
 0x6c3   :  { %v783_v56 = vpop.permute.xlu0 %782  ;;  %v892_v62 = vmul.f32 %v2292_v60, %v2622_v23 }
 0x6c4   :  { %v788_v57 = vsel %vm672_vm5, %v783_v56, 0 }
 0x6c5   :  { %2079 = vmatpush3.bf16.msra.mxu0 %v788_v57  ;;  %v893_v0 = vpack.c.bf16 %v892_v62, %v892_v62  ;;  %v2246_v57 = vld [vmem:[%s2820_s4 + $0x18] sm:$0xff]  }
 0x6c6   :  { %2090 = vmatprep.subr.bf16.mxu0 %v2317_v7 }
 0x6c8   :  { %2081 = vmatmul.mubr.msk.bf16.vlgmr.msra.gmra.mrb[24].mxu0 %vm656_vm6, %v780_v59 }
 0x6c9   :  { %2091 = vmatpush3.bf16.msra.mxu0 %v900_v61  ;;  %2092 = vmatprep.mubr.msk.bf16.mxu0 %vm2318_vm1, %v2317_v7 }
 0x6ca   :  { %2102 = vmatprep.subr.bf16.mxu0 %v2317_v7  ;;  %v2294_v1 = vpop.eup %2293 }
 0x6cb   :  { %v1004_v3 = vmul.f32 %v2294_v1, %v2626_v24 }
 0x6cd   :  { %v1005_v4 = vpack.c.bf16 %v1004_v3, %v1004_v3 }
 0x6d0   :  { %2093 = vmatmul.mubr.msk.bf16.vlgmr.msra.gmra.mrb[28].mxu0 %vm656_vm6, %v893_v0 }
 0x6d1   :  { %2103 = vmatpush3.bf16.msra.mxu0 %v1012_v2  ;;  %2104 = vmatprep.mubr.msk.bf16.mxu0 %vm2318_vm1, %v2317_v7 }
 0x6d2   :  { %2114 = vmatprep.subr.bf16.mxu0 %v2317_v7 }
 0x6d8   :  { %2105 = vmatmul.mubr.msk.bf16.vlgmr.msra.gmra.mrb[32].mxu0 %vm656_vm6, %v1005_v4 }
 0x6d9   :  { %2115 = vmatpush3.bf16.msra.mxu0 %v1141_v5  ;;  %2116 = vmatprep.mubr.msk.bf16.mxu0 %vm2318_vm1, %v2317_v7 }
 0x6da   :  { %2126 = vmatprep.subr.bf16.mxu0 %v2317_v7 }
 0x6f0   :  { %v1133_v6 = vpop.xlane.xlu1 %1132 }
 0x6f1   :  { %2295 = vrcp.f32 %v1133_v6 }
 0x6f4   :  { %v1244_v8 = vpop.xlane.xlu1 %1243  ;;  %v1357_v10 = vpop.xlane.xlu0 %1356 }
 0x6f5   :  { %2297 = vrcp.f32 %v1244_v8 }
 0x6f6   :  { %2299 = vrcp.f32 %v1357_v10 }
 0x6f8   :  { %v1250_v14 = vpop.permute.xlu0 %1249  ;;  %v1469_v18 = vpop.xlane.xlu1 %1468 }
 0x6f9   :  { %v1255_v9 = vsel %vm672_vm5, %v1250_v14, 0  ;;  %2301 = vrcp.f32 %v1469_v18 }
 0x6fb   :  { %v2296_v12 = vpop.eup %2295 }
 0x6fc   :  { %v1135_v13 = vmul.f32 %v2296_v12, %v2637_v39  ;;  %v1362_v20 = vpop.permute.xlu1 %1361  ;;  %v1474_v24 = vpop.permute.xlu0 %1473 }
 0x6fd   :  { %v1367_v23 = vsel %vm672_vm5, %v1362_v20, 0  ;;  %v1479_v27 = vsel %vm672_vm5, %v1474_v24, 0 }
 0x6fe   :  { %v1136_v16 = vpack.c.bf16 %v1135_v13, %v1135_v13 }
 0x6ff   :  { %v2298_v17 = vpop.eup %2297 }
 0x700   :  { %2117 = vmatmul.mubr.msk.bf16.vlgmr.msra.gmra.mrb[36].mxu0 %vm656_vm6, %v1136_v16  ;;  %v1246_v19 = vmul.f32 %v2298_v17, %v2639_v50  ;;  %v2300_v15 = vpop.eup %2299 }
 0x701   :  { %2127 = vmatpush3.bf16.msra.mxu0 %v1255_v9  ;;  %2128 = vmatprep.mubr.msk.bf16.mxu0 %vm2318_vm1, %v2317_v7  ;;  %v1359_v22 = vmul.f32 %v2300_v15, %v2643_v41 }
 0x702   :  { %2138 = vmatprep.subr.bf16.mxu0 %v2317_v7  ;;  %v1247_v21 = vpack.c.bf16 %v1246_v19, %v1246_v19 }
 0x703   :  { %v1360_v25 = vpack.c.bf16 %v1359_v22, %v1359_v22  ;;  %v2302_v26 = vpop.eup %2301  ;;  %v2315_v22 = vld [vmem:[%s2811_s0] sm:$0xff] }
 0x704   :  { %v1471_v28 = vmul.f32 %v2302_v26, %v2649_v44 }
 0x706   :  { %v1472_v29 = vpack.c.bf16 %v1471_v28, %v1471_v28 }
 0x708   :  { %2129 = vmatmul.mubr.msk.bf16.vlgmr.msra.gmra.mrb[40].mxu0 %vm656_vm6, %v1247_v21 }
 0x709   :  { %2139 = vmatpush3.bf16.msra.mxu0 %v1367_v23  ;;  %2140 = vmatprep.mubr.msk.bf16.mxu0 %vm2318_vm1, %v2317_v7 }
 0x70a   :  { %2150 = vmatprep.subr.bf16.mxu0 %v2317_v7 }
 0x710   :  { %2141 = vmatmul.mubr.msk.bf16.vlgmr.msra.gmra.mrb[44].mxu0 %vm656_vm6, %v1360_v25 }
 0x711   :  { %2151 = vmatpush3.bf16.msra.mxu0 %v1479_v27  ;;  %2152 = vmatprep.mubr.msk.bf16.mxu0 %vm2318_vm1, %v2317_v7  ;;  %v2316_v27 = vld [vmem:[%s2811_s0 + $0x8] sm:$0xff] }
 0x718   :  { %2153 = vmatmul.mubr.msk.bf16.vlgmr.msra.gmra.mrb[48].mxu0 %vm656_vm6, %v1472_v29 }
 0x719   :  { %1724 = vmatprep.mubr.bf16.mxu0 %v2319_v34  ;;  %v2243_v34 = vld [vmem:[%s2820_s4] sm:$0xff]  }
 0x71a   :  { %2157 = vmatpush3.bf16.msra.mxu1 %v2243_v34 }
 0x71b   :  { %2158 = vmatprep.subr.bf16.mxu1 %v2317_v7 }
 0x71e   :  { %2159 = vmatpush3.bf16.msra.mxu1 %v2244_v51  ;;  %v1928_v51 = vld [vmem:[%s2822_s2] ss:$0 sm:$0xff] }
 0x71f   :  { %2160 = vmatprep.subr.bf16.mxu1 %v2317_v7 }
 0x722   :  { %2161 = vmatpush3.bf16.msra.mxu1 %v2245_v54 }
 0x723   :  { %2162 = vmatprep.subr.bf16.mxu1 %v2317_v7 }
 0x726   :  { %2163 = vmatpush3.bf16.msra.mxu1 %v2246_v57  ;;  %v2261_v57 = vld [vmem:[%s2823_s6 + $0x10] sm:$0xff]  }
 0x727   :  { %2168 = vmatprep.subr.bf16.mxu1 %v2317_v7 }
 0x78e   :  { %v710_v30 = vpop.f32.mrb[20].mxu0 }
 0x78f   :  { %v2070_v31 = vpop.f32.mrb[21].mxu0 }
 0x790   :  { %v713_v32 = vpop.f32.mrb[22].mxu0 }
 0x791   :  { %v2071_v33 = vpop.f32.mrb[23].mxu0 }
 0x79b   :  { %v824_v35 = vpop.f32.mrb[24].mxu0 }
 0x79c   :  { %v2082_v36 = vpop.f32.mrb[25].mxu0 }
 0x79d   :  { %v827_v37 = vpop.f32.mrb[26].mxu0  ;;  %v2247_v36 = vld [vmem:[%s2821_s5] ss:$8 sps:$4 sm:$0xff]  }
 0x79e   :  { %v2083_v38 = vpop.f32.mrb[27].mxu0  ;;  %v2252_v37 = vld [vmem:[%s2821_s5 + $0x14] ss:$8 sps:$4 sm:$0xff]  }
 0x79f   :  { %v2250_v38 = vld [vmem:[%s2821_s5 + $0x10] ss:$8 sps:$4 sm:$0xff]  }
 0x7a3   :  { %v936_v39 = vpop.f32.mrb[28].mxu0 }
 0x7a4   :  { %v2094_v50 = vpop.f32.mrb[29].mxu0 }
 0x7a5   :  { %v939_v40 = vpop.f32.mrb[30].mxu0  ;;  %v2253_v50 = vld [vmem:[%s2821_s5 + $0x20] ss:$8 sps:$4 sm:$0xff]  }
 0x7a6   :  { %v2095_v41 = vpop.f32.mrb[31].mxu0  ;;  %v2258_v40 = vld [vmem:[%s2821_s5 + $0x34] ss:$8 sps:$4 sm:$0xff]  }
 0x7a7   :  { %v2256_v41 = vld [vmem:[%s2821_s5 + $0x30] ss:$8 sps:$4 sm:$0xff]  }
 0x7ab   :  { %v1048_v42 = vpop.f32.mrb[32].mxu0 }
 0x7ac   :  { %v2106_v43 = vpop.f32.mrb[33].mxu0 }
 0x7ad   :  { %v1051_v44 = vpop.f32.mrb[34].mxu0 }
 0x7ae   :  { %v2107_v45 = vpop.f32.mrb[35].mxu0 }
 0x7d3   :  { %v1177_v46 = vpop.f32.mrb[36].mxu0 }
 0x7d4   :  { %v2118_v47 = vpop.f32.mrb[37].mxu0 }
 0x7d5   :  { %v1180_v48 = vpop.f32.mrb[38].mxu0 }
 0x7d6   :  { %v2119_v49 = vpop.f32.mrb[39].mxu0 }
 0x7db   :  { %v1291_v52 = vpop.f32.mrb[40].mxu0 }
 0x7dc   :  { %v2198_v53 = vpack.i.bf16 %v1291_v52, %v824_v35  ;;  %v2130_v11 = vpop.f32.mrb[41].mxu0  ;;  %v2249_v35 = vld [vmem:[%s2821_s5 + $0x4] ss:$8 sps:$4 sm:$0xff]  }
 0x7dd   :  { %v1294_v55 = vpop.f32.mrb[42].mxu0  ;;  %1692 = vmatprep.subr.bf16.mxu0 %v2249_v35 }
 0x7de   :  { %2199 = vrot.lane.b32.xlu0 %v2198_v53, %s2326_s14  ;;  %v2131_v56 = vpop.f32.mrb[43].mxu0  ;;  %1693 = vmatpush1.bf16.msra.mxu0 %v2247_v36  ;;  %v2259_v55 = vld [vmem:[%s2823_s6] sm:$0xff]  }
 0x7df   :  { %1694 = vmatprep.subr.bf16.mxu0 %v2252_v37  ;;  %v2260_v56 = vld [vmem:[%s2823_s6 + $0x8] sm:$0xff]  }
 0x7e2   :  { %1695 = vmatpush1.bf16.msra.mxu0 %v2250_v38 }
 0x7e3   :  { %v1403_v58 = vpop.f32.mrb[44].mxu0 }
 0x7e4   :  { %v2203_v59 = vpack.i.bf16 %v1403_v58, %v936_v39  ;;  %v2142_v60 = vpop.f32.mrb[45].mxu0  ;;  %v2255_v39 = vld [vmem:[%s2821_s5 + $0x24] ss:$8 sps:$4 sm:$0xff]   ;;  %v2262_v58 = vld [vmem:[%s2823_s6 + $0x18] sm:$0xff]  }
 0x7e5   :  { %v1406_v61 = vpop.f32.mrb[46].mxu0  ;;  %1696 = vmatprep.subr.bf16.mxu0 %v2255_v39  ;;  %v2264_v60 = vld [vmem:[%s2823_s6 + $0x28] sm:$0xff]  }
 0x7e6   :  { %2204 = vrot.lane.b32.xlu1 %v2203_v59, %s2324_s1  ;;  %v2143_v62 = vpop.f32.mrb[47].mxu0  ;;  %1697 = vmatpush1.bf16.msra.mxu0 %v2253_v50  ;;  %v2263_v59 = vld [vmem:[%s2823_s6 + $0x20] sm:$0xff]   ;;  %v2265_v61 = vld [vmem:[%s2823_s6 + $0x30] sm:$0xff]  }
 0x7e7   :  { %1698 = vmatprep.subr.bf16.mxu0 %v2258_v40  ;;  %v2266_v62 = vld [vmem:[%s2823_s6 + $0x38] sm:$0xff]  }
 0x7ea   :  { %1699 = vmatpush1.bf16.msra.mxu0 %v2256_v41 }
 0x7eb   :  { %v1515_v63 = vpop.f32.mrb[48].mxu0 }
 0x7ec   :  { %v2208_v0 = vpack.i.bf16 %v1515_v63, %v1048_v42  ;;  %v2154_v1 = vpop.f32.mrb[49].mxu0 }
 0x7ed   :  { %v1518_v2 = vpop.f32.mrb[50].mxu0 }
 0x7ee   :  { %2209 = vrot.lane.b32.xlu0 %v2208_v0, %s2323_s29  ;;  %v2155_v3 = vpop.f32.mrb[51].mxu0 }
 0x850   :  { %v2200_v4 = vpop.permute.xlu0 %2199 }
 0x851   :  { %v2202_v6 = vunpack.i.h.bf16 %v2200_v4  ;;  %v2201_v8 = vunpack.i.l.bf16 %v2200_v4 }
 0x853   :  { %v1533_v14 = vsel %vm607_vm4, %v1177_v46, %v2202_v6  ;;  %v1066_v16 = vsel %vm607_vm4, %v710_v30, %v2201_v8 }
 0x858   :  { %v2205_v5 = vpop.permute.xlu1 %2204 }
 0x859   :  { %v2207_v10 = vunpack.i.h.bf16 %v2205_v5  ;;  %v2206_v12 = vunpack.i.l.bf16 %v2205_v5 }
 0x85b   :  { %v1534_v9 = vsel %vm1067_vm7, %v1533_v14, %v2207_v10  ;;  %v1068_v19 = vsel %vm1067_vm7, %v1066_v16, %v2206_v12 }
 0x860   :  { %v2210_v13 = vpop.permute.xlu0 %2209 }
 0x861   :  { %v2212_v17 = vunpack.i.h.bf16 %v2210_v13  ;;  %v2211_v18 = vunpack.i.l.bf16 %v2210_v13 }
 0x863   :  { %v1535_v20 = vsel %vm1069_vm8, %v1534_v9, %v2212_v17  ;;  %v1070_v21 = vsel %vm1069_vm8, %v1068_v19, %v2211_v18 }
 0x864   :  { %v1536_v15 = vpack.c.bf16 %v1535_v20, %v1070_v21 }
 0x866   :  { %2165 = vmatmul.mubr.msk.bf16.vlgmr.msra.gmra.mrb[40].mxu1 %vm49_vm0, %v1536_v15 }
 0x867   :  { %2184 = vmatprep.mubr.msk.bf16.mxu1 %vm2318_vm1, %v2317_v7  ;;  %2169 = vmatpush3.bf16.msra.mxu1 %v2259_v55 }
 0x868   :  { %2170 = vmatprep.subr.bf16.mxu1 %v2317_v7 }
 0x86b   :  { %2171 = vmatpush3.bf16.msra.mxu1 %v2260_v56 }
 0x86c   :  { %2172 = vmatprep.subr.bf16.mxu1 %v2317_v7 }
 0x86f   :  { %2173 = vmatpush3.bf16.msra.mxu1 %v2261_v57 }
 0x870   :  { %2174 = vmatprep.subr.bf16.mxu1 %v2317_v7 }
 0x873   :  { %2175 = vmatpush3.bf16.msra.mxu1 %v2262_v58 }
 0x874   :  { %2176 = vmatprep.subr.bf16.mxu1 %v2317_v7 }
 0x877   :  { %2177 = vmatpush3.bf16.msra.mxu1 %v2263_v59 }
 0x878   :  { %2178 = vmatprep.subr.bf16.mxu1 %v2317_v7 }
 0x87b   :  { %2179 = vmatpush3.bf16.msra.mxu1 %v2264_v60 }
 0x87c   :  { %2180 = vmatprep.subr.bf16.mxu1 %v2317_v7 }
 0x87f   :  { %2181 = vmatpush3.bf16.msra.mxu1 %v2265_v61 }
 0x880   :  { %2182 = vmatprep.subr.bf16.mxu1 %v2317_v7 }
 0x883   :  { %2183 = vmatpush3.bf16.msra.mxu1 %v2266_v62 }
 0x939   :  { %v1606_v23 = vpop.f32.mrb[40].mxu1 }
 0x93a   :  { %v2727_v24 = vadd.f32 %v2315_v22, %v1606_v23  ;;  %v2166_v25 = vpop.f32.mrb[41].mxu1 }
 0x93b   :  { %v1609_v26 = vpop.f32.mrb[42].mxu1 }
 0x93c   :  { %v2732_v28 = vadd.f32 %v2316_v27, %v1609_v26  ;;  %v2167_v29 = vpop.f32.mrb[43].mxu1  ;;  %v1615_v30 = vmul.f32 %v2727_v24, %v2727_v24 }
 0x93e   :  { %v1617_v31 = vsel %vm49_vm0, %v1615_v30, 0.0  ;;  %v1616_v32 = vmul.f32 %v2732_v28, %v2732_v28 }
 0x93f   :  { %1618 = vadd.xlane.f32.xlu1 %v1617_v31 }
 0x940   :  { %v1620_v33 = vsel %vm49_vm0, %v1616_v32, 0.0 }
 0x941   :  { %1621 = vadd.xlane.f32.xlu0 %v1620_v33 }
 0x9cc   :  { %v1619_v42 = vpop.xlane.xlu1 %1618 }
 0x9cd   :  { %v1623_v43 = vmul.f32 0.015625, %v1619_v42 }
 0x9ce   :  { %v1622_v44 = vpop.xlane.xlu0 %1621 }
 0x9cf   :  { %v1625_v45 = vadd.f32 1e-05, %v1623_v43  ;;  %v1624_v46 = vmul.f32 0.015625, %v1622_v44 }
 0x9d1   :  { %2303 = vrsqrt.f32 %v1625_v45  ;;  %v1626_v47 = vadd.f32 1e-05, %v1624_v46 }
 0x9d3   :  { %2305 = vrsqrt.f32 %v1626_v47 }
 0x9db   :  { %v2304_v34 = vpop.eup %2303 }
 0x9dc   :  { %v1629_v48 = vmul.f32 %v2304_v34, %v2727_v24 }
 0x9dd   :  { %v2306_v49 = vpop.eup %2305 }
 0x9de   :  { %v1630_v52 = vmul.f32 %v2306_v49, %v2732_v28  ;;  %v1638_v53 = vmul.f32 %v1928_v51, %v1629_v48 }
 0x9e0   :  { %v1639_v11 = vmul.f32 %v1928_v51, %v1630_v52 }
 0x9e2   :  { %v1640_v54 = vpack.c.bf16 %v1639_v11, %v1638_v53 }
 0x9e4   :  { %1937 = vmatmul.mubr.msk.bf16.vlgmr.msra.gmra.mrb[52].mxu0 %vm49_vm0, %v1640_v54 }
 0xab7   :  { %v1726_v63 = vpop.f32.mrb[52].mxu0 }
 0xab8   :  { %v1735_v0 = vsub.f32 0.0, %v1726_v63  ;;  %v1728_v1 = vpop.f32.mrb[53].mxu0 }
 0xab9   :  { %v1730_v2 = vpop.f32.mrb[54].mxu0 }
 0xaba   :  { %v1737_v3 = vmul.f32 1.442695, %v1735_v0  ;;  %v1736_v4 = vsub.f32 0.0, %v1730_v2  ;;  %v1732_v5 = vpop.f32.mrb[55].mxu0 }
 0xabc   :  { %2307 = vpow2.f32 %v1737_v3  ;;  %v1739_v6 = vmul.f32 1.442695, %v1736_v4 }
 0xabe   :  { %2309 = vpow2.f32 %v1739_v6 }
 0xac6   :  { %v2308_v8 = vpop.eup %2307 }
 0xac7   :  { %v1741_v10 = vadd.f32 1.0, %v2308_v8 }
 0xac8   :  { %v2310_v12 = vpop.eup %2309 }
 0xac9   :  { %2311 = vrcp.f32 %v1741_v10  ;;  %v1742_v7 = vadd.f32 1.0, %v2310_v12 }
 0xacb   :  { %2313 = vrcp.f32 %v1742_v7 }
 0xad3   :  { %v2312_v13 = vpop.eup %2311 }
 0xad4   :  { %v1745_v14 = vmul.f32 %v2312_v13, %v1726_v63 }
 0xad5   :  { %v2314_v16 = vpop.eup %2313 }
 0xad6   :  { %v1747_v17 = vmul.f32 %v1745_v14, %v1728_v1  ;;  %v1746_v18 = vmul.f32 %v2314_v16, %v1730_v2 }
 0xad8   :  { %v1748_v9 = vmul.f32 %v1746_v18, %v1732_v5 }
 0xada   :  { %v1749_v19 = vpack.c.bf16 %v1748_v9, %v1747_v17 }
 0xadc   :  { %2185 = vmatmul.mubr.bf16.vlgmr.msra.gmra.mrb[44].mxu1 %v1749_v19 }
 0xbaf   :  { %v1848_v20 = vpop.f32.mrb[44].mxu1 }
 0xbb0   :  { %v1855_v21 = vadd.f32 %v1848_v20, %v2727_v24  ;;  %v2186_v15 = vpop.f32.mrb[45].mxu1 }
 0xbb1   :  { %v1851_v23 = vpop.f32.mrb[46].mxu1 }
 0xbb2   :  { %1857 = vst.msk [vmem:[%s2824_s13] sm:$0xff] %vm49_vm0, %v1855_v21  ;;  %v1856_v22 = vadd.f32 %v1851_v23, %v2732_v28  ;;  %v2187_v25 = vpop.f32.mrb[47].mxu1 }
 0xbb4   :  { %1858 = vst.msk [vmem:[%s2824_s13 + $0x8] sm:$0xff] %vm49_vm0, %v1856_v22 }

</bundles_post_ra>
